<compile_context>
chip_gen: v7x
topology: tpu7x:2x2x1
jax: 0.10.0
libtpu: 0.0.40
codegen_flags: <defaults>
</compile_context>

<pallas_src>
import jax
import jax.numpy as jnp
from jax.experimental import pallas as pl
from jax.experimental.pallas import tpu as pltpu

GAIN = 1.4142135623730951
COORD_PAD = 8  # coords carried as a zero-padded [N, 8] slab (3 real lanes)


# ----------------------------- Pallas kernel ------------------------------- #

def _silu(x):
    return x * jax.nn.sigmoid(x)


def _dot(a, b):
    return jnp.dot(a, b, preferred_element_type=jnp.float32)


def egnn_fused_kernel(
    # graph-static tensors (whole arrays resident in VMEM)
    h0_ref, x0_ref, grow_ref, gcol_ref, growt_ref, invc_ref, ea_ref,
    # embedding weights
    wi_ref, bi_ref, wo_ref, bo_ref,
    # stacked per-layer weights, leading axis = layer
    we1h_ref, we1t_ref, we1r_ref, we1e_ref, be1_ref,
    we2_ref, be2_ref,
    wc1_ref, bc1_ref, wc2t_ref,
    wn1h_ref, wn1a_ref, bn1_ref, wn2_ref, bn2_ref,
    # outputs
    outh_ref, outx_ref,
):
    n_layers = we1h_ref.shape[0]
    ea_is_scalar = ea_ref.shape[-1] == 1

    # Graph-static operands: loaded from VMEM once, reused by every layer.
    g_row = grow_ref[...]        # [E, N] one-hot gather (row endpoint)
    g_col = gcol_ref[...]        # [E, N] one-hot gather (col endpoint)
    g_row_t = growt_ref[...]     # [N, E] scatter-add matrix (precomputed)
    g_diff = g_row - g_col       # [E, N] combined gather for coord[row]-coord[col]
    inv_cnt = invc_ref[...]      # [N, 1] 1/count for the segment mean
    e_attr = ea_ref[...]         # [E, EA]

    # embedding_in
    h = _dot(h0_ref[...], wi_ref[...]) + bi_ref[...]   # [N, H]
    coord = x0_ref[...]                                # [N, 8] (lanes 3.. are 0)

    def layer(l, carry):
        h, coord = carry

        # ---- edge model: src/tgt projections done in node space first ----
        ph_s = _dot(h, we1h_ref[l])                    # [N, H]
        ph_t = _dot(h, we1t_ref[l])                    # [N, H]

        # ---- coord2radial via the combined (row - col) gather matrix ----
        coord_diff = _dot(g_diff, coord)               # [E, 8]
        radial = jnp.sum(coord_diff * coord_diff, axis=1, keepdims=True)  # [E, 1]

        pre1 = (_dot(g_row, ph_s) + _dot(g_col, ph_t)
                + radial * we1r_ref[l] + be1_ref[l])
        if ea_is_scalar:
            pre1 = pre1 + e_attr * we1e_ref[l]         # [E,1]*[1,H] VPU broadcast
        else:
            pre1 = pre1 + _dot(e_attr, we1e_ref[l])
        m = _silu(pre1)
        edge_feat = _silu(_dot(m, we2_ref[l]) + be2_ref[l])     # [E, H]

        # ---- coord model: coord + mean_row(coord_diff * coord_mlp(m)) ----
        c1 = _silu(_dot(edge_feat, wc1_ref[l]) + bc1_ref[l])
        phi = jnp.sum(c1 * wc2t_ref[l], axis=1, keepdims=True)  # [E,1] (VPU+XLU)
        trans = coord_diff * phi                                # [E, 8]
        agg_c = _dot(g_row_t, trans) * inv_cnt                  # segment mean [N,8]
        coord = coord + agg_c

        # ---- node model: node_mlp(concat([h, segsum(edge_feat)])) + h ----
        agg_h = _dot(g_row_t, edge_feat)                        # segment sum [N,H]
        n1 = _silu(_dot(h, wn1h_ref[l]) + _dot(agg_h, wn1a_ref[l]) + bn1_ref[l])
        h = h + _dot(n1, wn2_ref[l]) + bn2_ref[l]               # residual=True
        return h, coord

    h, coord = jax.lax.fori_loop(0, n_layers, layer, (h, coord))

    # embedding_out + coord writeback (single stores at the very end)
    outh_ref[...] = _dot(h, wo_ref[...]) + bo_ref[...]
    outx_ref[...] = coord


# ------------------------------ EGNN forward -------------------------------- #

def egnn_forward(params, h0, x0, g_row, g_col, edge_attr):
    n = h0.shape[0]
    x_dim = x0.shape[1]
    out_nf = params["emb_out_w"].shape[1]

    # Pad the edge dimension to a sublane multiple; zero rows in g_row/g_col
    # gather zeros and scatter nothing, so padded edges are inert.
    e = g_row.shape[0]
    e_pad = ((e + 7) // 8) * 8
    if e_pad != e:
        pad = ((0, e_pad - e), (0, 0))
        g_row = jnp.pad(g_row, pad)
        g_col = jnp.pad(g_col, pad)
        edge_attr = jnp.pad(edge_attr, pad)

    # Graph-static helpers, computed once in the wrapper.
    g_row_t = g_row.T                                       # [N, E] scatter matrix
    count = jnp.sum(g_row, axis=0)[:, None]                 # [N, 1]
    inv_count = 1.0 / jnp.maximum(count, 1.0)
    x0_pad = jnp.zeros((n, COORD_PAD), jnp.float32).at[:, :x_dim].set(x0)
    wc2_t = jnp.swapaxes(params["wc2"], 1, 2)               # [L, 1, H]

    vmem = pl.BlockSpec(memory_space=pltpu.MemorySpace.VMEM)
    inputs = (
        h0, x0_pad, g_row, g_col, g_row_t, inv_count, edge_attr,
        params["emb_in_w"], params["emb_in_b"],
        params["emb_out_w"], params["emb_out_b"],
        params["we1_src"], params["we1_tgt"], params["we1_rad"],
        params["we1_ea"], params["be1"],
        params["we2"], params["be2"],
        params["wc1"], params["bc1"], wc2_t,
        params["wn1_h"], params["wn1_agg"], params["bn1"],
        params["wn2"], params["bn2"],
    )

    h_out, x_slab = pl.pallas_call(
        egnn_fused_kernel,
        out_shape=(jax.ShapeDtypeStruct((n, out_nf), jnp.float32),
                   jax.ShapeDtypeStruct((n, COORD_PAD), jnp.float32)),
        in_specs=[vmem] * len(inputs),
        out_specs=(vmem, vmem),
    )(*inputs)

    return h_out, x_slab[:, :x_dim]


# --------------------------- parameter construction ------------------------ #

def _init_linear(key, fan_in, fan_out, bias=True, xavier_gain=None):
    kw, kb = jax.random.split(key)
    if xavier_gain is None:
        bound = 1.0 / (fan_in ** 0.5)        # torch.nn.Linear default-style
    else:
        bound = xavier_gain * (6.0 / (fan_in + fan_out)) ** 0.5
    w = jax.random.uniform(kw, (fan_in, fan_out), jnp.float32, -bound, bound)
    b = (jax.random.uniform(kb, (1, fan_out), jnp.float32, -bound, bound)
         if bias else None)
    return w, b


def make_egnn_params(key, in_node_nf, hidden_nf, out_node_nf, in_edge_nf, n_layers):
    keys = jax.random.split(key, 2 + n_layers)
    emb_in_w, emb_in_b = _init_linear(keys[0], in_node_nf, hidden_nf)
    emb_out_w, emb_out_b = _init_linear(keys[1], hidden_nf, out_node_nf)

    per_layer = []
    for i in range(n_layers):
        lk = jax.random.split(keys[2 + i], 6)
        edge_in = 2 * hidden_nf + 1 + in_edge_nf
        we1, be1 = _init_linear(lk[0], edge_in, hidden_nf)
        we2, be2 = _init_linear(lk[1], hidden_nf, hidden_nf)
        wn1, bn1 = _init_linear(lk[2], hidden_nf + hidden_nf, hidden_nf)
        wn2, bn2 = _init_linear(lk[3], hidden_nf, hidden_nf)
        wc1, bc1 = _init_linear(lk[4], hidden_nf, hidden_nf)
        wc2, _ = _init_linear(lk[5], hidden_nf, 1, bias=False, xavier_gain=GAIN)
        per_layer.append(dict(
            we1_src=we1[:hidden_nf],
            we1_tgt=we1[hidden_nf:2 * hidden_nf],
            we1_rad=we1[2 * hidden_nf:2 * hidden_nf + 1],
            we1_ea=we1[2 * hidden_nf + 1:],
            be1=be1, we2=we2, be2=be2,
            wc1=wc1, bc1=bc1, wc2=wc2,
            wn1_h=wn1[:hidden_nf], wn1_agg=wn1[hidden_nf:],
            bn1=bn1, wn2=wn2, bn2=bn2,
        ))
    stacked = {k: jnp.stack([layer[k] for layer in per_layer], axis=0)
               for k in per_layer[0]}
    return dict(emb_in_w=emb_in_w, emb_in_b=emb_in_b,
                emb_out_w=emb_out_w, emb_out_b=emb_out_b, **stacked)


# pure-JAX reference (matches the PyTorch module semantics) for validation
def egnn_reference(params, h0, x0, row, col, edge_attr):
    n = h0.shape[0]
    h = h0 @ params["emb_in_w"] + params["emb_in_b"]
    x = x0
    n_layers = params["we1_src"].shape[0]
    for i in range(n_layers):
        cdiff = x[row] - x[col]
        radial = jnp.sum(cdiff ** 2, axis=1, keepdims=True)
        we1 = jnp.concatenate([params["we1_src"][i], params["we1_tgt"][i],
                               params["we1_rad"][i], params["we1_ea"][i]], axis=0)
        ein = jnp.concatenate([h[row], h[col], radial, edge_attr], axis=1)
        m = jax.nn.silu(ein @ we1 + params["be1"][i])
        m = jax.nn.silu(m @ params["we2"][i] + params["be2"][i])
        c1 = jax.nn.silu(m @ params["wc1"][i] + params["bc1"][i])
        phi = c1 @ params["wc2"][i]
        trans = cdiff * phi
        agg_c = jnp.zeros((n, 3), jnp.float32).at[row].add(trans)
        count = jnp.zeros((n, 3), jnp.float32).at[row].add(jnp.ones_like(trans))
        x = x + agg_c / jnp.maximum(count, 1.0)
        agg_h = jnp.zeros((n, h.shape[1]), jnp.float32).at[row].add(m)
        wn1 = jnp.concatenate([params["wn1_h"][i], params["wn1_agg"][i]], axis=0)
        nin = jnp.concatenate([h, agg_h], axis=1)
        n1 = jax.nn.silu(nin @ wn1 + params["bn1"][i])
        h = h + (n1 @ params["wn2"][i] + params["bn2"][i])
    h = h @ params["emb_out_w"] + params["emb_out_b"]
    return h, x


# ---------------------------------- main ------------------------------------ #

if __name__ == "__main__":
    N = 8            # nodes
    IN_NF = 4        # input node features
    HID = 32         # hidden features
    OUT_NF = 6       # output node features
    EA = 1           # edge attribute dim (in_edge_nf)
    N_LAYERS = 4

    key = jax.random.PRNGKey(0)
    k_h, k_x, k_ea, k_p = jax.random.split(key, 4)

    # fully connected graph without self loops
    row = jnp.array([i for i in range(N) for j in range(N) if j != i], jnp.int32)
    col = jnp.array([j for i in range(N) for j in range(N) if j != i], jnp.int32)
    E = row.shape[0]  # 56

    h0 = jax.random.normal(k_h, (N, IN_NF), jnp.float32)
    x0 = jax.random.normal(k_x, (N, 3), jnp.float32)
    edge_attr = jax.random.normal(k_ea, (E, EA), jnp.float32)

    # one-hot gather matrices for the graph (scatter matrix = transpose)
    g_row = jax.nn.one_hot(row, N, dtype=jnp.float32)   # [E, N]
    g_col = jax.nn.one_hot(col, N, dtype=jnp.float32)   # [E, N]

    params = make_egnn_params(k_p, IN_NF, HID, OUT_NF, EA, N_LAYERS)

    fwd = jax.jit(egnn_forward)
    h_out, x_out = fwd(params, h0, x0, g_row, g_col, edge_attr)
    h_out = jax.block_until_ready(h_out)
    x_out = jax.block_until_ready(x_out)

    h_ref, x_ref = egnn_reference(params, h0, x0, row, col, edge_attr)

    assert h_out.shape == (N, OUT_NF) and x_out.shape == (N, 3)
    assert jnp.allclose(h_out, h_ref, atol=2e-2, rtol=2e-2)
    assert jnp.allclose(x_out, x_ref, atol=2e-2, rtol=2e-2)

    # TODO(synk): the torch.allclose "coordinates did not change" print in
    # coord_model is a host-side log with no effect on outputs; omitted.
    print("KERNEL_OK")
</pallas_src>

<mosaic_0001>
module attributes {stable_mosaic.version = 11 : i64} {
  func.func @egnn_fused_kernel(%arg0: memref<8x4xf32, #tpu.memory_space<vmem>>, %arg1: memref<8x8xf32, #tpu.memory_space<vmem>>, %arg2: memref<56x8xf32, #tpu.memory_space<vmem>>, %arg3: memref<56x8xf32, #tpu.memory_space<vmem>>, %arg4: memref<8x56xf32, #tpu.memory_space<vmem>>, %arg5: memref<8x1xf32, #tpu.memory_space<vmem>>, %arg6: memref<56x1xf32, #tpu.memory_space<vmem>>, %arg7: memref<4x32xf32, #tpu.memory_space<vmem>>, %arg8: memref<1x32xf32, #tpu.memory_space<vmem>>, %arg9: memref<32x6xf32, #tpu.memory_space<vmem>>, %arg10: memref<1x6xf32, #tpu.memory_space<vmem>>, %arg11: memref<4x32x32xf32, #tpu.memory_space<vmem>>, %arg12: memref<4x32x32xf32, #tpu.memory_space<vmem>>, %arg13: memref<4x1x32xf32, #tpu.memory_space<vmem>>, %arg14: memref<4x1x32xf32, #tpu.memory_space<vmem>>, %arg15: memref<4x1x32xf32, #tpu.memory_space<vmem>>, %arg16: memref<4x32x32xf32, #tpu.memory_space<vmem>>, %arg17: memref<4x1x32xf32, #tpu.memory_space<vmem>>, %arg18: memref<4x32x32xf32, #tpu.memory_space<vmem>>, %arg19: memref<4x1x32xf32, #tpu.memory_space<vmem>>, %arg20: memref<4x1x32xf32, #tpu.memory_space<vmem>>, %arg21: memref<4x32x32xf32, #tpu.memory_space<vmem>>, %arg22: memref<4x32x32xf32, #tpu.memory_space<vmem>>, %arg23: memref<4x1x32xf32, #tpu.memory_space<vmem>>, %arg24: memref<4x32x32xf32, #tpu.memory_space<vmem>>, %arg25: memref<4x1x32xf32, #tpu.memory_space<vmem>>, %arg26: memref<8x6xf32, #tpu.memory_space<vmem>>, %arg27: memref<8x8xf32, #tpu.memory_space<vmem>>) attributes {dimension_semantics = [], scalar_prefetch = 0 : i64, scratch_operands = 0 : i64, tpu.core_type = #tpu.core_type<tc>} {
    %c0 = arith.constant 0 : index
    %c0_0 = arith.constant 0 : index
    %0 = vector.load %arg2[%c0, %c0_0] : memref<56x8xf32, #tpu.memory_space<vmem>>, vector<56x8xf32>
    %c0_1 = arith.constant 0 : index
    %c0_2 = arith.constant 0 : index
    %1 = vector.load %arg3[%c0_1, %c0_2] : memref<56x8xf32, #tpu.memory_space<vmem>>, vector<56x8xf32>
    %c0_3 = arith.constant 0 : index
    %c0_4 = arith.constant 0 : index
    %2 = vector.load %arg4[%c0_3, %c0_4] : memref<8x56xf32, #tpu.memory_space<vmem>>, vector<8x56xf32>
    %3 = arith.subf %0, %1 : vector<56x8xf32>
    %c0_5 = arith.constant 0 : index
    %c0_6 = arith.constant 0 : index
    %4 = vector.load %arg5[%c0_5, %c0_6] : memref<8x1xf32, #tpu.memory_space<vmem>>, vector<8x1xf32>
    %c0_7 = arith.constant 0 : index
    %c0_8 = arith.constant 0 : index
    %5 = vector.load %arg6[%c0_7, %c0_8] : memref<56x1xf32, #tpu.memory_space<vmem>>, vector<56x1xf32>
    %c0_9 = arith.constant 0 : index
    %c0_10 = arith.constant 0 : index
    %6 = vector.load %arg0[%c0_9, %c0_10] : memref<8x4xf32, #tpu.memory_space<vmem>>, vector<8x4xf32>
    %c0_11 = arith.constant 0 : index
    %c0_12 = arith.constant 0 : index
    %7 = vector.load %arg7[%c0_11, %c0_12] : memref<4x32xf32, #tpu.memory_space<vmem>>, vector<4x32xf32>
    %cst = arith.constant dense<0.000000e+00> : vector<8x32xf32>
    %8 = tpu.matmul %6, %7, %cst {dimension_numbers = #tpu.dot_dimension_numbers<[1], [0], [0], [1], [0, 0, 1, 1], [], []>} : vector<8x4xf32>, vector<4x32xf32>, vector<8x32xf32> -> vector<8x32xf32>
    %c0_13 = arith.constant 0 : index
    %c0_14 = arith.constant 0 : index
    %9 = vector.load %arg8[%c0_13, %c0_14] : memref<1x32xf32, #tpu.memory_space<vmem>>, vector<1x32xf32>
    %10 = vector.broadcast %9 : vector<1x32xf32> to vector<8x32xf32>
    %11 = arith.addf %8, %10 : vector<8x32xf32>
    %c0_15 = arith.constant 0 : index
    %c0_16 = arith.constant 0 : index
    %12 = vector.load %arg1[%c0_15, %c0_16] : memref<8x8xf32, #tpu.memory_space<vmem>>, vector<8x8xf32>
    %c0_i32 = arith.constant 0 : i32
    %c4_i32 = arith.constant 4 : i32
    %13 = arith.addi %c0_i32, %c4_i32 : i32
    %c1_i32 = arith.constant 1 : i32
    %14:2 = scf.for %arg28 = %c0_i32 to %13 step %c1_i32 iter_args(%arg29 = %11, %arg30 = %12) -> (vector<8x32xf32>, vector<8x8xf32>)  : i32 {
      %22 = arith.index_cast %arg28 : i32 to index
      %c0_27 = arith.constant 0 : index
      %c0_28 = arith.constant 0 : index
      %23 = vector.load %arg11[%22, %c0_27, %c0_28] : memref<4x32x32xf32, #tpu.memory_space<vmem>>, vector<1x32x32xf32>
      %24 = vector.shape_cast %23 : vector<1x32x32xf32> to vector<32x32xf32>
      %cst_29 = arith.constant dense<0.000000e+00> : vector<8x32xf32>
      %25 = tpu.matmul %arg29, %24, %cst_29 {dimension_numbers = #tpu.dot_dimension_numbers<[1], [0], [0], [1], [0, 0, 1, 1], [], []>} : vector<8x32xf32>, vector<32x32xf32>, vector<8x32xf32> -> vector<8x32xf32>
      %26 = arith.index_cast %arg28 : i32 to index
      %c0_30 = arith.constant 0 : index
      %c0_31 = arith.constant 0 : index
      %27 = vector.load %arg12[%26, %c0_30, %c0_31] : memref<4x32x32xf32, #tpu.memory_space<vmem>>, vector<1x32x32xf32>
      %28 = vector.shape_cast %27 : vector<1x32x32xf32> to vector<32x32xf32>
      %cst_32 = arith.constant dense<0.000000e+00> : vector<8x32xf32>
      %29 = tpu.matmul %arg29, %28, %cst_32 {dimension_numbers = #tpu.dot_dimension_numbers<[1], [0], [0], [1], [0, 0, 1, 1], [], []>} : vector<8x32xf32>, vector<32x32xf32>, vector<8x32xf32> -> vector<8x32xf32>
      %cst_33 = arith.constant dense<0.000000e+00> : vector<56x8xf32>
      %30 = tpu.matmul %3, %arg30, %cst_33 {dimension_numbers = #tpu.dot_dimension_numbers<[1], [0], [0], [1], [0, 0, 1, 1], [], []>} : vector<56x8xf32>, vector<8x8xf32>, vector<56x8xf32> -> vector<56x8xf32>
      %31 = arith.mulf %30, %30 : vector<56x8xf32>
      %cst_34 = arith.constant dense<0.000000e+00> : vector<56xf32>
      %32 = vector.multi_reduction <add>, %31, %cst_34 [1] : vector<56x8xf32> to vector<56xf32>
      %33 = vector.shape_cast %32 : vector<56xf32> to vector<56x1xf32>
      %cst_35 = arith.constant dense<0.000000e+00> : vector<56x32xf32>
      %34 = tpu.matmul %0, %25, %cst_35 {dimension_numbers = #tpu.dot_dimension_numbers<[1], [0], [0], [1], [0, 0, 1, 1], [], []>} : vector<56x8xf32>, vector<8x32xf32>, vector<56x32xf32> -> vector<56x32xf32>
      %cst_36 = arith.constant dense<0.000000e+00> : vector<56x32xf32>
      %35 = tpu.matmul %1, %29, %cst_36 {dimension_numbers = #tpu.dot_dimension_numbers<[1], [0], [0], [1], [0, 0, 1, 1], [], []>} : vector<56x8xf32>, vector<8x32xf32>, vector<56x32xf32> -> vector<56x32xf32>
      %36 = arith.addf %34, %35 : vector<56x32xf32>
      %37 = arith.index_cast %arg28 : i32 to index
      %c0_37 = arith.constant 0 : index
      %c0_38 = arith.constant 0 : index
      %38 = vector.load %arg13[%37, %c0_37, %c0_38] : memref<4x1x32xf32, #tpu.memory_space<vmem>>, vector<1x1x32xf32>
      %39 = vector.shape_cast %38 : vector<1x1x32xf32> to vector<1x32xf32>
      %40 = vector.broadcast %33 : vector<56x1xf32> to vector<56x32xf32>
      %41 = vector.broadcast %39 : vector<1x32xf32> to vector<56x32xf32>
      %42 = arith.mulf %40, %41 : vector<56x32xf32>
      %43 = arith.addf %36, %42 : vector<56x32xf32>
      %44 = arith.index_cast %arg28 : i32 to index
      %c0_39 = arith.constant 0 : index
      %c0_40 = arith.constant 0 : index
      %45 = vector.load %arg15[%44, %c0_39, %c0_40] : memref<4x1x32xf32, #tpu.memory_space<vmem>>, vector<1x1x32xf32>
      %46 = vector.shape_cast %45 : vector<1x1x32xf32> to vector<1x32xf32>
      %47 = vector.broadcast %46 : vector<1x32xf32> to vector<56x32xf32>
      %48 = arith.addf %43, %47 : vector<56x32xf32>
      %49 = arith.index_cast %arg28 : i32 to index
      %c0_41 = arith.constant 0 : index
      %c0_42 = arith.constant 0 : index
      %50 = vector.load %arg14[%49, %c0_41, %c0_42] : memref<4x1x32xf32, #tpu.memory_space<vmem>>, vector<1x1x32xf32>
      %51 = vector.shape_cast %50 : vector<1x1x32xf32> to vector<1x32xf32>
      %52 = vector.broadcast %5 : vector<56x1xf32> to vector<56x32xf32>
      %53 = vector.broadcast %51 : vector<1x32xf32> to vector<56x32xf32>
      %54 = arith.mulf %52, %53 : vector<56x32xf32>
      %55 = arith.addf %48, %54 : vector<56x32xf32>
      %56 = arith.negf %55 : vector<56x32xf32>
      %57 = math.exp %56 : vector<56x32xf32>
      %cst_43 = arith.constant 1.000000e+00 : f32
      %58 = vector.broadcast %cst_43 : f32 to vector<56x32xf32>
      %59 = arith.addf %58, %57 : vector<56x32xf32>
      %60 = arith.divf %58, %59 : vector<56x32xf32>
      %61 = arith.mulf %55, %60 : vector<56x32xf32>
      %62 = arith.index_cast %arg28 : i32 to index
      %c0_44 = arith.constant 0 : index
      %c0_45 = arith.constant 0 : index
      %63 = vector.load %arg16[%62, %c0_44, %c0_45] : memref<4x32x32xf32, #tpu.memory_space<vmem>>, vector<1x32x32xf32>
      %64 = vector.shape_cast %63 : vector<1x32x32xf32> to vector<32x32xf32>
      %cst_46 = arith.constant dense<0.000000e+00> : vector<56x32xf32>
      %65 = tpu.matmul %61, %64, %cst_46 {dimension_numbers = #tpu.dot_dimension_numbers<[1], [0], [0], [1], [0, 0, 1, 1], [], []>} : vector<56x32xf32>, vector<32x32xf32>, vector<56x32xf32> -> vector<56x32xf32>
      %66 = arith.index_cast %arg28 : i32 to index
      %c0_47 = arith.constant 0 : index
      %c0_48 = arith.constant 0 : index
      %67 = vector.load %arg17[%66, %c0_47, %c0_48] : memref<4x1x32xf32, #tpu.memory_space<vmem>>, vector<1x1x32xf32>
      %68 = vector.shape_cast %67 : vector<1x1x32xf32> to vector<1x32xf32>
      %69 = vector.broadcast %68 : vector<1x32xf32> to vector<56x32xf32>
      %70 = arith.addf %65, %69 : vector<56x32xf32>
      %71 = arith.negf %70 : vector<56x32xf32>
      %72 = math.exp %71 : vector<56x32xf32>
      %cst_49 = arith.constant 1.000000e+00 : f32
      %73 = vector.broadcast %cst_49 : f32 to vector<56x32xf32>
      %74 = arith.addf %73, %72 : vector<56x32xf32>
      %75 = arith.divf %73, %74 : vector<56x32xf32>
      %76 = arith.mulf %70, %75 : vector<56x32xf32>
      %77 = arith.index_cast %arg28 : i32 to index
      %c0_50 = arith.constant 0 : index
      %c0_51 = arith.constant 0 : index
      %78 = vector.load %arg18[%77, %c0_50, %c0_51] : memref<4x32x32xf32, #tpu.memory_space<vmem>>, vector<1x32x32xf32>
      %79 = vector.shape_cast %78 : vector<1x32x32xf32> to vector<32x32xf32>
      %cst_52 = arith.constant dense<0.000000e+00> : vector<56x32xf32>
      %80 = tpu.matmul %76, %79, %cst_52 {dimension_numbers = #tpu.dot_dimension_numbers<[1], [0], [0], [1], [0, 0, 1, 1], [], []>} : vector<56x32xf32>, vector<32x32xf32>, vector<56x32xf32> -> vector<56x32xf32>
      %81 = arith.index_cast %arg28 : i32 to index
      %c0_53 = arith.constant 0 : index
      %c0_54 = arith.constant 0 : index
      %82 = vector.load %arg19[%81, %c0_53, %c0_54] : memref<4x1x32xf32, #tpu.memory_space<vmem>>, vector<1x1x32xf32>
      %83 = vector.shape_cast %82 : vector<1x1x32xf32> to vector<1x32xf32>
      %84 = vector.broadcast %83 : vector<1x32xf32> to vector<56x32xf32>
      %85 = arith.addf %80, %84 : vector<56x32xf32>
      %86 = arith.negf %85 : vector<56x32xf32>
      %87 = math.exp %86 : vector<56x32xf32>
      %cst_55 = arith.constant 1.000000e+00 : f32
      %88 = vector.broadcast %cst_55 : f32 to vector<56x32xf32>
      %89 = arith.addf %88, %87 : vector<56x32xf32>
      %90 = arith.divf %88, %89 : vector<56x32xf32>
      %91 = arith.mulf %85, %90 : vector<56x32xf32>
      %92 = arith.index_cast %arg28 : i32 to index
      %c0_56 = arith.constant 0 : index
      %c0_57 = arith.constant 0 : index
      %93 = vector.load %arg20[%92, %c0_56, %c0_57] : memref<4x1x32xf32, #tpu.memory_space<vmem>>, vector<1x1x32xf32>
      %94 = vector.shape_cast %93 : vector<1x1x32xf32> to vector<1x32xf32>
      %95 = vector.broadcast %94 : vector<1x32xf32> to vector<56x32xf32>
      %96 = arith.mulf %91, %95 : vector<56x32xf32>
      %cst_58 = arith.constant dense<0.000000e+00> : vector<56xf32>
      %97 = vector.multi_reduction <add>, %96, %cst_58 [1] : vector<56x32xf32> to vector<56xf32>
      %98 = vector.shape_cast %97 : vector<56xf32> to vector<56x1xf32>
      %99 = vector.broadcast %98 : vector<56x1xf32> to vector<56x8xf32>
      %100 = arith.mulf %30, %99 : vector<56x8xf32>
      %cst_59 = arith.constant dense<0.000000e+00> : vector<8x8xf32>
      %101 = tpu.matmul %2, %100, %cst_59 {dimension_numbers = #tpu.dot_dimension_numbers<[1], [0], [0], [1], [0, 0, 1, 1], [], []>} : vector<8x56xf32>, vector<56x8xf32>, vector<8x8xf32> -> vector<8x8xf32>
      %102 = vector.broadcast %4 : vector<8x1xf32> to vector<8x8xf32>
      %103 = arith.mulf %101, %102 : vector<8x8xf32>
      %104 = arith.addf %arg30, %103 : vector<8x8xf32>
      %cst_60 = arith.constant dense<0.000000e+00> : vector<8x32xf32>
      %105 = tpu.matmul %2, %76, %cst_60 {dimension_numbers = #tpu.dot_dimension_numbers<[1], [0], [0], [1], [0, 0, 1, 1], [], []>} : vector<8x56xf32>, vector<56x32xf32>, vector<8x32xf32> -> vector<8x32xf32>
      %106 = arith.index_cast %arg28 : i32 to index
      %c0_61 = arith.constant 0 : index
      %c0_62 = arith.constant 0 : index
      %107 = vector.load %arg21[%106, %c0_61, %c0_62] : memref<4x32x32xf32, #tpu.memory_space<vmem>>, vector<1x32x32xf32>
      %108 = vector.shape_cast %107 : vector<1x32x32xf32> to vector<32x32xf32>
      %cst_63 = arith.constant dense<0.000000e+00> : vector<8x32xf32>
      %109 = tpu.matmul %arg29, %108, %cst_63 {dimension_numbers = #tpu.dot_dimension_numbers<[1], [0], [0], [1], [0, 0, 1, 1], [], []>} : vector<8x32xf32>, vector<32x32xf32>, vector<8x32xf32> -> vector<8x32xf32>
      %110 = arith.index_cast %arg28 : i32 to index
      %c0_64 = arith.constant 0 : index
      %c0_65 = arith.constant 0 : index
      %111 = vector.load %arg22[%110, %c0_64, %c0_65] : memref<4x32x32xf32, #tpu.memory_space<vmem>>, vector<1x32x32xf32>
      %112 = vector.shape_cast %111 : vector<1x32x32xf32> to vector<32x32xf32>
      %cst_66 = arith.constant dense<0.000000e+00> : vector<8x32xf32>
      %113 = tpu.matmul %105, %112, %cst_66 {dimension_numbers = #tpu.dot_dimension_numbers<[1], [0], [0], [1], [0, 0, 1, 1], [], []>} : vector<8x32xf32>, vector<32x32xf32>, vector<8x32xf32> -> vector<8x32xf32>
      %114 = arith.addf %109, %113 : vector<8x32xf32>
      %115 = arith.index_cast %arg28 : i32 to index
      %c0_67 = arith.constant 0 : index
      %c0_68 = arith.constant 0 : index
      %116 = vector.load %arg23[%115, %c0_67, %c0_68] : memref<4x1x32xf32, #tpu.memory_space<vmem>>, vector<1x1x32xf32>
      %117 = vector.shape_cast %116 : vector<1x1x32xf32> to vector<1x32xf32>
      %118 = vector.broadcast %117 : vector<1x32xf32> to vector<8x32xf32>
      %119 = arith.addf %114, %118 : vector<8x32xf32>
      %120 = arith.negf %119 : vector<8x32xf32>
      %121 = math.exp %120 : vector<8x32xf32>
      %cst_69 = arith.constant 1.000000e+00 : f32
      %122 = vector.broadcast %cst_69 : f32 to vector<8x32xf32>
      %123 = arith.addf %122, %121 : vector<8x32xf32>
      %124 = arith.divf %122, %123 : vector<8x32xf32>
      %125 = arith.mulf %119, %124 : vector<8x32xf32>
      %126 = arith.index_cast %arg28 : i32 to index
      %c0_70 = arith.constant 0 : index
      %c0_71 = arith.constant 0 : index
      %127 = vector.load %arg24[%126, %c0_70, %c0_71] : memref<4x32x32xf32, #tpu.memory_space<vmem>>, vector<1x32x32xf32>
      %128 = vector.shape_cast %127 : vector<1x32x32xf32> to vector<32x32xf32>
      %cst_72 = arith.constant dense<0.000000e+00> : vector<8x32xf32>
      %129 = tpu.matmul %125, %128, %cst_72 {dimension_numbers = #tpu.dot_dimension_numbers<[1], [0], [0], [1], [0, 0, 1, 1], [], []>} : vector<8x32xf32>, vector<32x32xf32>, vector<8x32xf32> -> vector<8x32xf32>
      %130 = arith.addf %arg29, %129 : vector<8x32xf32>
      %131 = arith.index_cast %arg28 : i32 to index
      %c0_73 = arith.constant 0 : index
      %c0_74 = arith.constant 0 : index
      %132 = vector.load %arg25[%131, %c0_73, %c0_74] : memref<4x1x32xf32, #tpu.memory_space<vmem>>, vector<1x1x32xf32>
      %133 = vector.shape_cast %132 : vector<1x1x32xf32> to vector<1x32xf32>
      %134 = vector.broadcast %133 : vector<1x32xf32> to vector<8x32xf32>
      %135 = arith.addf %130, %134 : vector<8x32xf32>
      scf.yield %135, %104 : vector<8x32xf32>, vector<8x8xf32>
    }
    %c4_i32_17 = arith.constant 4 : i32
    %c0_18 = arith.constant 0 : index
    %c0_19 = arith.constant 0 : index
    %15 = vector.load %arg9[%c0_18, %c0_19] : memref<32x6xf32, #tpu.memory_space<vmem>>, vector<32x6xf32>
    %cst_20 = arith.constant dense<0.000000e+00> : vector<8x6xf32>
    %16 = tpu.matmul %14#0, %15, %cst_20 {dimension_numbers = #tpu.dot_dimension_numbers<[1], [0], [0], [1], [0, 0, 1, 1], [], []>} : vector<8x32xf32>, vector<32x6xf32>, vector<8x6xf32> -> vector<8x6xf32>
    %c0_21 = arith.constant 0 : index
    %c0_22 = arith.constant 0 : index
    %17 = vector.load %arg10[%c0_21, %c0_22] : memref<1x6xf32, #tpu.memory_space<vmem>>, vector<1x6xf32>
    %18 = vector.broadcast %17 : vector<1x6xf32> to vector<8x6xf32>
    %19 = arith.addf %16, %18 : vector<8x6xf32>
    %c0_23 = arith.constant 0 : index
    %c0_24 = arith.constant 0 : index
    %20 = vector.load %arg26[%c0_23, %c0_24] : memref<8x6xf32, #tpu.memory_space<vmem>>, vector<8x6xf32>
    tpu.vector_store %arg26[%c0_23, %c0_24], %19 {strides = array<i32>} : memref<8x6xf32, #tpu.memory_space<vmem>>, vector<8x6xf32>,
    %c0_25 = arith.constant 0 : index
    %c0_26 = arith.constant 0 : index
    %21 = vector.load %arg27[%c0_25, %c0_26] : memref<8x8xf32, #tpu.memory_space<vmem>>, vector<8x8xf32>
    tpu.vector_store %arg27[%c0_25, %c0_26], %14#1 {strides = array<i32>} : memref<8x8xf32, #tpu.memory_space<vmem>>, vector<8x8xf32>,
    return
  }
}

</mosaic_0001>

<bundles_post_ra>
// kernel: egnn_forward.1
= control target key start
LH: loop header
LB: loop body
LE: loop exit
PB: predicated region body
PF: predicated region fallthrough
CT: control target
= control target key end

     0   :  { %s3517_s0 = inlined_call_operand.vmem [shape: f32[8,4], index: 0, kind: input, shape index: {}]   ;;  %s3518_s1 = inlined_call_operand.vmem [shape: f32[8,8], index: 1, kind: input, shape index: {}]   ;;  %s3519_s2 = inlined_call_operand.vmem [shape: f32[56,8], index: 2, kind: input, shape index: {}]   ;;  %s3520_s3 = inlined_call_operand.vmem [shape: f32[56,8], index: 3, kind: input, shape index: {}]   ;;  %s3521_s4 = inlined_call_operand.vmem [shape: f32[8,56], index: 4, kind: input, shape index: {}]   ;;  %s3522_s5 = inlined_call_operand.vmem [shape: f32[8,1], index: 5, kind: input, shape index: {}]   ;;  %s3523_s6 = inlined_call_operand.vmem [shape: f32[56,1], index: 6, kind: input, shape index: {}]   ;;  %s3524_s7 = inlined_call_operand.vmem [shape: f32[4,32], index: 7, kind: input, shape index: {}]   ;;  %s3525_s8 = inlined_call_operand.vmem [shape: f32[1,32], index: 8, kind: input, shape index: {}]   ;;  %s3526_s9 = inlined_call_operand.vmem [shape: f32[32,6], index: 9, kind: input, shape index: {}]   ;;  %s3527_s10 = inlined_call_operand.vmem [shape: f32[1,6], index: 10, kind: input, shape index: {}]   ;;  %s3528_s11 = inlined_call_operand.vmem [shape: f32[4,32,32], index: 11, kind: input, shape index: {}]   ;;  %s3529_s12 = inlined_call_operand.vmem [shape: f32[4,32,32], index: 12, kind: input, shape index: {}]   ;;  %s3530_s13 = inlined_call_operand.vmem [shape: f32[4,1,32], index: 13, kind: input, shape index: {}]   ;;  %s3531_s14 = inlined_call_operand.vmem [shape: f32[4,1,32], index: 14, kind: input, shape index: {}]   ;;  %s3532_s15 = inlined_call_operand.vmem [shape: f32[4,1,32], index: 15, kind: input, shape index: {}]   ;;  %s3533_s16 = inlined_call_operand.hbm [shape: f32[4,32,32], index: 16, kind: input, shape index: {}]   ;;  %s3534_s17 = inlined_call_operand.vmem [shape: f32[4,1,32], index: 17, kind: input, shape index: {}]   ;;  %s3535_s18 = inlined_call_operand.hbm [shape: f32[4,32,32], index: 18, kind: input, shape index: {}]   ;;  %s3536_s19 = inlined_call_operand.vmem [shape: f32[4,1,32], index: 19, kind: input, shape index: {}]   ;;  %s3537_s20 = inlined_call_operand.vmem [shape: f32[4,1,32], index: 20, kind: input, shape index: {}]   ;;  %s3538_s21 = inlined_call_operand.hbm [shape: f32[4,32,32], index: 21, kind: input, shape index: {}]   ;;  %s3539_s22 = inlined_call_operand.hbm [shape: f32[4,32,32], index: 22, kind: input, shape index: {}]   ;;  %s3540_s23 = inlined_call_operand.vmem [shape: f32[4,1,32], index: 23, kind: input, shape index: {}]   ;;  %s3541_s24 = inlined_call_operand.hbm [shape: f32[4,32,32], index: 24, kind: input, shape index: {}]   ;;  %s3542_s25 = inlined_call_operand.vmem [shape: f32[4,1,32], index: 25, kind: input, shape index: {}]   ;;  %s3543_s26 = inlined_call_operand.hbm [shape: f32[8,6], index: 26, kind: output, shape index: {0}]   ;;  %s3544_s27 = inlined_call_operand.vmem [shape: f32[8,8], index: 27, kind: output, shape index: {1}]  }
   0x1   :  { %3552 = sst [smem:[#allocation16_spill]] %s3517_s0 }
   0x2   :  { %3553 = sst [smem:[#allocation17_spill]] %s3518_s1 }
   0x3   :  { %3554 = sst [smem:[#allocation18_spill]] %s3519_s2 }
   0x4   :  { %3555 = sst [smem:[#allocation19_spill]] %s3520_s3 }
   0x5   :  { %3556 = sst [smem:[#allocation20_spill]] %s3521_s4 }
   0x6   :  { %3557 = sst [smem:[#allocation21_spill]] %s3522_s5 }
   0x7   :  { %3558 = sst [smem:[#allocation22_spill]] %s3523_s6 }
   0x8   :  { %3559 = sst [smem:[#allocation23_spill]] %s3524_s7 }
   0x9   :  { %3560 = sst [smem:[#allocation24_spill]] %s3525_s8 }
   0xa   :  { %3561 = sst [smem:[#allocation25_spill]] %s3526_s9 }
   0xb   :  { %3562 = sst [smem:[#allocation26_spill]] %s3527_s10 }
   0xc   :  { %3563 = sst [smem:[#allocation27_spill]] %s3528_s11 }
   0xd   :  { %33 = vsyncpa [#allocation3], 0 }
   0xe   :  { %34 = vsyncpa [#allocation6], 0 }
   0xf   :  { %35 = vsyncpa [#allocation9], 0 }
  0x10   :  { %36 = vsyncpa [#allocation4], 0  ;;  %s2693_s7 = smov [#allocation5]   ;;  %s2694_s8 = smov [#allocation8]  }
  0x11   :  { %s88_s4 = sshll.u32 %s2693_s7, 4  ;;  %s116_s30 = sshll.u32 %s2694_s8, 4  ;;  %s89_s4 = int_to_ptr.vmem [resolvable:$true] %s88_s4  ;;  %s2848_s30 = int_to_ptr.vmem [resolvable:$true] %s116_s30 }
  0x12   :  { %s2529_s28 = scalar_lea.hbm %s3535_s18, 2048 }
  0x13   :  { %p2530_p0 = scmp.ne.s32.totalorder %s3535_s18, %s2529_s28  ;;  %p2533_p1 = scmp.lt.u32.totalorder %s2529_s28, %s3535_s18 }
  0x15   :  { %p2535_p2 = pnand %p2533_p1, %p2530_p0 }
  0x17   :  { %2538 = shalt.err (!%p2535_p2)
}
  0x18   :  { %s2539_s6 = scalar_lea.vmem %s89_s4, 2048  ;;  %p2544_p4 = scmp.lt.s32.totalorder %s89_s4, %s89_s4 }
  0x19   :  { %p2540_p3 = scmp.ne.s32.totalorder %s89_s4, %s2539_s6  ;;  %p2545_p5 = scmp.lt.s32.totalorder %s2539_s6, %s2539_s6 }
  0x1b   :  { %p2546_p6 = por %p2545_p5, %p2544_p4 }
  0x1d   :  { %p2547_p7 = pnand %p2546_p6, %p2540_p3 }
  0x1f   :  { %2550 = shalt.err (!%p2547_p7)
}
  0x20   :  { %s2695_s11 = smov 128   ;;  %s2696_s2 = smov 8  }
  0x21   :  { %94 = dma.hbm_to_vmem [thread:$0]  %s3535_s18, 2048, %s89_s4, [#allocation6], %s2695_s11, %s2695_s11, %s2696_s2  }
  0x22   :  { %s2551_s5 = scalar_lea.hbm %s3539_s22, 2048 }
  0x23   :  { %p2552_p8 = scmp.ne.s32.totalorder %s3539_s22, %s2551_s5  ;;  %p2555_p9 = scmp.lt.u32.totalorder %s2551_s5, %s3539_s22 }
  0x25   :  { %p2557_p10 = pnand %p2555_p9, %p2552_p8 }
  0x27   :  { %2560 = shalt.err (!%p2557_p10)
}
  0x28   :  { %s2561_s1 = scalar_lea.vmem %s2848_s30, 2048  ;;  %p2566_p12 = scmp.lt.s32.totalorder %s2848_s30, %s2848_s30 }
  0x29   :  { %p2562_p11 = scmp.ne.s32.totalorder %s2848_s30, %s2561_s1  ;;  %p2567_p13 = scmp.lt.s32.totalorder %s2561_s1, %s2561_s1 }
  0x2b   :  { %p2568_p0 = por %p2567_p13, %p2566_p12 }
  0x2d   :  { %p2569_p1 = pnand %p2568_p0, %p2562_p11 }
  0x2f   :  { %2572 = shalt.err (!%p2569_p1)
}
  0x30   :  { %122 = dma.hbm_to_vmem [thread:$0]  %s3539_s22, 2048, %s2848_s30, [#allocation9], %s2695_s11, %s2695_s11, %s2696_s2  }
  0x31   :  { %s2697_s6 = smov [#allocation2]   ;;  %s2698_s7 = smov [#allocation7]  }
  0x32   :  { %s74_s3 = sshll.u32 %s2697_s6, 4  ;;  %s104_s8 = sshll.u32 %s2698_s7, 4  ;;  %s75_s3 = int_to_ptr.vmem [resolvable:$true] %s74_s3  ;;  %s2885_s8 = int_to_ptr.vmem [resolvable:$true] %s104_s8 }
  0x33   :  { %s2573_s28 = scalar_lea.hbm %s3533_s16, 2048 }
  0x34   :  { %p2574_p2 = scmp.ne.s32.totalorder %s3533_s16, %s2573_s28  ;;  %p2577_p3 = scmp.lt.u32.totalorder %s2573_s28, %s3533_s16 }
  0x36   :  { %p2579_p4 = pnand %p2577_p3, %p2574_p2 }
  0x38   :  { %2582 = shalt.err (!%p2579_p4)
}
  0x39   :  { %s2583_s22 = scalar_lea.vmem %s75_s3, 2048  ;;  %p2588_p6 = scmp.lt.s32.totalorder %s75_s3, %s75_s3 }
  0x3a   :  { %p2584_p5 = scmp.ne.s32.totalorder %s75_s3, %s2583_s22  ;;  %p2589_p7 = scmp.lt.s32.totalorder %s2583_s22, %s2583_s22 }
  0x3c   :  { %p2590_p8 = por %p2589_p7, %p2588_p6 }
  0x3e   :  { %p2591_p9 = pnand %p2590_p8, %p2584_p5 }
  0x40   :  { %2594 = shalt.err (!%p2591_p9)
}
  0x41   :  { %80 = dma.hbm_to_vmem [thread:$0]  %s3533_s16, 2048, %s75_s3, [#allocation3], %s2695_s11, %s2695_s11, %s2696_s2  }
  0x42   :  { %s2595_s7 = scalar_lea.hbm %s3538_s21, 2048 }
  0x43   :  { %p2596_p10 = scmp.ne.s32.totalorder %s3538_s21, %s2595_s7  ;;  %p2599_p11 = scmp.lt.u32.totalorder %s2595_s7, %s3538_s21 }
  0x45   :  { %p2601_p12 = pnand %p2599_p11, %p2596_p10 }
  0x47   :  { %2604 = shalt.err (!%p2601_p12)
}
  0x48   :  { %s2605_s10 = scalar_lea.vmem %s2885_s8, 2048  ;;  %p2610_p0 = scmp.lt.s32.totalorder %s2885_s8, %s2885_s8 }
  0x49   :  { %p2606_p13 = scmp.ne.s32.totalorder %s2885_s8, %s2605_s10  ;;  %p2611_p1 = scmp.lt.s32.totalorder %s2605_s10, %s2605_s10 }
  0x4b   :  { %p2612_p2 = por %p2611_p1, %p2610_p0 }
  0x4d   :  { %p2613_p3 = pnand %p2612_p2, %p2606_p13 }
  0x4f   :  { %2616 = shalt.err (!%p2613_p3)
}
  0x50   :  { %110 = dma.hbm_to_vmem [thread:$0]  %s3538_s21, 2048, %s2885_s8, [#allocation6], %s2695_s11, %s2695_s11, %s2696_s2  }
  0x51   :  { %s2699_s29 = smov [#allocation10]   ;;  %s2617_s18 = scalar_lea.hbm %s3541_s24, 2048 }
  0x52   :  { %s130_s1 = sshll.u32 %s2699_s29, 4  ;;  %p2618_p4 = scmp.ne.s32.totalorder %s3541_s24, %s2617_s18  ;;  %s131_s1 = int_to_ptr.vmem [resolvable:$true] %s130_s1 }
  0x53   :  { %p2621_p5 = scmp.lt.u32.totalorder %s2617_s18, %s3541_s24 }
  0x55   :  { %p2623_p6 = pnand %p2621_p5, %p2618_p4 }
  0x57   :  { %2626 = shalt.err (!%p2623_p6)
}
  0x58   :  { %s2627_s5 = scalar_lea.vmem %s131_s1, 2048  ;;  %p2632_p8 = scmp.lt.s32.totalorder %s131_s1, %s131_s1 }
  0x59   :  { %p2628_p7 = scmp.ne.s32.totalorder %s131_s1, %s2627_s5  ;;  %p2633_p9 = scmp.lt.s32.totalorder %s2627_s5, %s2627_s5 }
  0x5b   :  { %p2634_p10 = por %p2633_p9, %p2632_p8 }
  0x5d   :  { %p2635_p11 = pnand %p2634_p10, %p2628_p7 }
  0x5f   :  { %2638 = shalt.err (!%p2635_p11)
}
  0x60   :  { %136 = dma.hbm_to_vmem [thread:$0]  %s3541_s24, 2048, %s131_s1, [#allocation9], %s2695_s11, %s2695_s11, %s2696_s2  }
  0x61   :  { %2673 = dma.done.wait [#allocation3], 2048  }
  0x62   :  { %2674 = vsyncadd [#allocation3], 4294965248 }
  0x63   :  { %2675 = dma.done.wait [#allocation6], 4096  }
  0x64   :  { %2676 = vsyncadd [#allocation6], 4294963200 }
  0x65   :  { %2677 = dma.done.wait [#allocation9], 4096  }
  0x66   :  { %2678 = vsyncadd [#allocation9], 4294963200  ;;  %v3549_v0 = vmov 0.0   ;;  %vm2701_vm0 = vmmov 0   ;;  %s3564_s10 = sld [smem:[#allocation18_spill]]  ;;  %s3565_s5 = sld [smem:[#allocation19_spill]] }
  0x67   :  { %2102 = vmatprep.subr.mxu0 %v3549_v0  ;;  %2104 = vmatprep.mubr.msk.f32.mxu0 %vm2701_vm0, %v3549_v0  ;;  %s3566_s18 = sld [smem:[#allocation20_spill]]  ;;  %s3567_s7 = sld [smem:[#allocation21_spill]]  ;;  %vm197_vm1 = vcmask 1043456   ;;  %vm193_vm2 = vcmask 31744  }
  0x68   :  { %s3568_s21 = sld [smem:[#allocation22_spill]]  ;;  %s3569_s4 = sld [smem:[#allocation17_spill]] }
  0x69   :  { %s3570_s9 = sld [smem:[#allocation23_spill]]  ;;  %s3571_s28 = sld [smem:[#allocation16_spill]] }
  0x6a   :  { %s3572_s24 = sld [smem:[#allocation24_spill]] }
  0x6c   :  { %v2943_v1 = vld [vmem:[%s3564_s10] sm:$0xff]  ;;  %v2948_v2 = vld [vmem:[%s3564_s10 + $0x8] sm:$0xff]  ;;  %v2953_v3 = vld [vmem:[%s3564_s10 + $0x10] sm:$0xff] }
  0x6d   :  { %v2958_v4 = vld [vmem:[%s3564_s10 + $0x18] sm:$0xff]  ;;  %v2963_v5 = vld [vmem:[%s3564_s10 + $0x20] sm:$0xff]  ;;  %v2968_v6 = vld [vmem:[%s3564_s10 + $0x28] sm:$0xff] }
  0x6e   :  { %v2973_v7 = vld [vmem:[%s3564_s10 + $0x30] sm:$0xff]  ;;  %v2978_v8 = vld [vmem:[%s3565_s5] sm:$0xff]  ;;  %v2983_v9 = vld [vmem:[%s3565_s5 + $0x8] sm:$0xff] }
  0x6f   :  { %v2988_v10 = vld [vmem:[%s3565_s5 + $0x10] sm:$0xff]  ;;  %v2993_v11 = vld [vmem:[%s3565_s5 + $0x18] sm:$0xff]  ;;  %v2998_v12 = vld [vmem:[%s3565_s5 + $0x20] sm:$0xff] }
  0x70   :  { %v3007_v15 = vld [vmem:[%s3565_s5 + $0x28] sm:$0xff]  ;;  %v3012_v16 = vld [vmem:[%s3565_s5 + $0x30] sm:$0xff]  ;;  %v3017_v17 = vld [vmem:[%s3566_s18] sm:$0xff] }
  0x71   :  { %v3032_v23 = vld [vmem:[%s3567_s7] sm:$0xff]  ;;  %v3042_v25 = vld [vmem:[%s3568_s21 + $0x8] sm:$0xff]  ;;  %v3047_v26 = vld [vmem:[%s3568_s21 + $0x10] sm:$0xff] }
  0x72   :  { %v3037_v24 = vld [vmem:[%s3568_s21] sm:$0xff]  ;;  %v3052_v27 = vld [vmem:[%s3568_s21 + $0x18] sm:$0xff]  ;;  %v3062_v29 = vld [vmem:[%s3568_s21 + $0x28] sm:$0xff] }
  0x73   :  { %v3057_v28 = vld [vmem:[%s3568_s21 + $0x20] sm:$0xff]  ;;  %v3067_v30 = vld [vmem:[%s3568_s21 + $0x30] sm:$0xff]  ;;  %s3085_s21 = smov 0  }
  0x74   :  { %v271_v31 = vld [vmem:[%s3569_s4] sm:$0xff]  }
  0x75   :  { %v185_v32 = vld [vmem:[%s3570_s9] sm:$0xf] }
  0x76   :  { %v184_v33 = vld [vmem:[%s3571_s28] sm:$0xff]  ;;  %2103 = vmatpush3.msk.msra.mxu0 %vm197_vm1, %v185_v32 }
  0x77   :  { %2105 = vmatmul.mubr.msk.f32.vlgmr.msra.gmra.mrb[0].mxu0 %vm193_vm2, %v184_v33  ;;  %v1930_v34 = vld [vmem:[%s3572_s24] ss:$0 sm:$0xff] }
 0x14a   :  { %v267_v35 = vpop.f32.mrb[0].mxu0 }
 0x14b   :  { %v268_v36 = vadd.f32 %v1930_v34, %v267_v35   ;;  %v2106_v37 = vpop.f32.mrb[1].mxu0 }
 0x14c LB: > { %v2702_v38 = vmov 0.0|0.0   ;;  %s3099_s10 = sshll.u32 %s2691_s21, 5  ;;  %vm2703_vm3 = vmmov 0   ;;  %v3550_v39 = vmov 0.0   ;;  %s3573_s3 = sld [smem:[#allocation27_spill]]  ;;  %v2705_v40 = vmov 0   ;;  %s2691_s21 = sphi %s3085_s21, %s277_s21   ;;  %v2687_v36 = vphi %v268_v36, %v3586_v36   ;;  %v2683_v31 = vphi %v271_v31, %v3585_v31  }
 0x14d   : > { %2334 = vmatprep.subr.bf16.mxu0 %v2702_v38  ;;  %2340 = vmatprep.subr.bf16.mxu1 %v2702_v38  ;;  %s360_s30 = scalar_lea.vmem %s3529_s12, %s3099_s10  ;;  %vm286_vm4 = vcmask 261120   ;;  %vm435_vm5 = vcmask 64512   ;;  %v3574_v13 = vsub.f32 %v2943_v1, %v2978_v8  ;;  %v3575_v14 = vsub.f32 %v2948_v2, %v2983_v9  ;;  %s970_s18 = scalar_lea.vmem [#allocation2], %s3099_s10 }
 0x14e   : > { %2115 = vmatprep.mubr.msk.f32.mxu0 %vm2703_vm3, %v3550_v39  ;;  %2126 = vmatprep.mubr.msk.f32.mxu1 %vm2703_vm3, %v3550_v39  ;;  %v361_v43 = vld [vmem:[%s360_s30] sm:$0xff]  ;;  %v362_v45 = vld [vmem:[%s360_s30 + $0x8] sm:$0xff]  ;;  %v363_v49 = vld [vmem:[%s360_s30 + $0x10] sm:$0xff]  ;;  %v3576_v18 = vsub.f32 %v2953_v3, %v2988_v10  ;;  %v3577_v19 = vsub.f32 %v2958_v4, %v2993_v11  ;;  %v3578_v20 = vsub.f32 %v2963_v5, %v2998_v12  ;;  %s827_s7 = scalar_lea.vmem %s3530_s13, %s2691_s21  ;;  %s849_s8 = scalar_lea.vmem %s3532_s15, %s2691_s21  ;;  %vm1379_vm6 = vcmask 457728  }
 0x14f   : > { %2440 = vset.pattern.permute.xlu0 %v2705_v40  ;;  %2439 = vset.pattern.permute.xlu1 %v2705_v40  ;;  %v2341_v48 = vpack.c.bf16 %v362_v45, %v361_v43  ;;  %v364_v50 = vld [vmem:[%s360_s30 + $0x18] sm:$0xff]  ;;  %v3579_v21 = vsub.f32 %v2968_v6, %v3007_v15  ;;  %v3580_v22 = vsub.f32 %v2973_v7, %v3012_v16  ;;  %s864_s16 = scalar_lea.vmem %s3531_s14, %s2691_s21  ;;  %s1153_s24 = scalar_lea.vmem [#allocation5], %s3099_s10 }
 0x150   : > { %873 = vperm.xlu0 %2440, %v3042_v25   ;;  %868 = vperm.xlu1 %2439, %v3037_v24   ;;  %v2344_v52 = vpack.c.bf16 %v364_v50, %v363_v49  ;;  %s1158_s22 = scalar_lea.vmem %s3536_s19, %s2691_s21  ;;  %s1336_s4 = scalar_lea.vmem %s3537_s20, %s2691_s21 }
 0x151   : > { %2342 = vmatpush3.bf16.msra.mxu1 %v2341_v48  ;;  %s1535_s6 = scalar_lea.vmem [#allocation8], %s3099_s10  ;;  %s1699_s9 = scalar_lea.vmem [#allocation10], %s3099_s10 }
 0x152   : > { %s281_s29 = scalar_lea.vmem %s3573_s3, %s3099_s10  ;;  %2343 = vmatprep.subr.bf16.mxu1 %v2702_v38  ;;  %s975_s3 = scalar_lea.vmem %s3534_s17, %s2691_s21 }
 0x153   : > { %v282_v41 = vld [vmem:[%s281_s29] sm:$0xff]  ;;  %v283_v42 = vld [vmem:[%s281_s29 + $0x8] sm:$0xff]  ;;  %v284_v46 = vld [vmem:[%s281_s29 + $0x10] sm:$0xff]  ;;  %s1683_s28 = scalar_lea.vmem %s3540_s23, %s2691_s21 }
 0x154   : > { %v2335_v44 = vpack.c.bf16 %v283_v42, %v282_v41  ;;  %v285_v47 = vld [vmem:[%s281_s29 + $0x18] sm:$0xff]  ;;  %878 = vperm.xlu0 %2440, %v3047_v26  }
 0x155   : > { %v2338_v51 = vpack.c.bf16 %v285_v47, %v284_v46  ;;  %2345 = vmatpush3.bf16.msra.mxu1 %v2344_v52 }
 0x156   : > { %2336 = vmatpush3.bf16.msra.mxu0 %v2335_v44  ;;  %2152 = vmatprep.subr.mxu1 %v3550_v39 }
 0x157   : > { %2337 = vmatprep.subr.bf16.mxu0 %v2702_v38 }
 0x158   : > { %883 = vperm.xlu0 %2440, %v3052_v27   ;;  %2127 = vmatmul.mubr.msk.f32.vlgmr.msra.gmra.mrb[0].mxu1 %vm286_vm4, %v2687_v36 }
 0x159   : > { %2154 = vmatprep.mubr.msk.f32.mxu1 %vm2703_vm3, %v3550_v39 }
 0x15a   : > { %2339 = vmatpush3.bf16.msra.mxu0 %v2338_v51 }
 0x15b   : > { %2129 = vmatprep.subr.mxu0 %v3550_v39 }
 0x15c   : > { %888 = vperm.xlu0 %2440, %v3057_v28  }
 0x15d   : > { %2116 = vmatmul.mubr.msk.f32.vlgmr.msra.gmra.mrb[0].mxu0 %vm286_vm4, %v2687_v36 }
 0x15e   : > { %2130 = vmatpush3.msra.mxu0 %v2683_v31  ;;  %2131 = vmatprep.mubr.msk.f32.mxu0 %vm2703_vm3, %v3550_v39 }
 0x15f   : > { %2175 = vmatprep.subr.mxu0 %v3550_v39 }
 0x161   : > { %2132 = vmatmul.mubr.msk.f32.vlgmr.msra.gmra.mrb[2].mxu0 %vm435_vm5, %v3574_v13 }
 0x162   : > { %2134 = vmatprep.mubr.msk.f32.mxu0 %vm2703_vm3, %v3550_v39 }
 0x165   : > { %2135 = vmatmul.mubr.msk.f32.gmra.mrb[4].mxu0 %vm435_vm5, %v3575_v14 }
 0x166   : > { %2137 = vmatprep.mubr.msk.f32.mxu0 %vm2703_vm3, %v3550_v39 }
 0x169   : > { %2138 = vmatmul.mubr.msk.f32.gmra.mrb[6].mxu0 %vm435_vm5, %v3576_v18 }
 0x16a   : > { %2140 = vmatprep.mubr.msk.f32.mxu0 %vm2703_vm3, %v3550_v39 }
 0x16d   : > { %2141 = vmatmul.mubr.msk.f32.gmra.mrb[8].mxu0 %vm435_vm5, %v3577_v19 }
 0x16e   : > { %2143 = vmatprep.mubr.msk.f32.mxu0 %vm2703_vm3, %v3550_v39 }
 0x171   : > { %2144 = vmatmul.mubr.msk.f32.gmra.mrb[10].mxu0 %vm435_vm5, %v3578_v20 }
 0x172   : > { %2146 = vmatprep.mubr.msk.f32.mxu0 %vm2703_vm3, %v3550_v39 }
 0x175   : > { %2147 = vmatmul.mubr.msk.f32.gmra.mrb[12].mxu0 %vm435_vm5, %v3579_v21 }
 0x176   : > { %2149 = vmatprep.mubr.msk.f32.mxu0 %vm2703_vm3, %v3550_v39 }
 0x179   : > { %2150 = vmatmul.mubr.msk.f32.gmra.mrb[14].mxu0 %vm435_vm5, %v3580_v22 }
 0x17a   : > { %2177 = vmatprep.mubr.msk.f32.mxu0 %vm2703_vm3, %v3550_v39 }
 0x22b   : > { %v431_v54 = vpop.f32.mrb[0].mxu1 }
 0x22c   : > { %2153 = vmatpush3.msra.mxu1 %v431_v54  ;;  %v2128_v56 = vpop.f32.mrb[1].mxu1 }
 0x22d   : > { %2155 = vmatmul.mubr.msk.f32.vlgmr.msra.gmra.mrb[2].mxu1 %vm435_vm5, %v2978_v8  ;;  %2346 = vmatprep.subr.bf16.mxu1 %v2702_v38  ;;  %v971_v56 = vld [vmem:[%s970_s18] sm:$0xff] }
 0x22e   : > { %2157 = vmatprep.mubr.msk.f32.mxu1 %vm2703_vm3, %v3550_v39 }
 0x230   : > { %v356_v53 = vpop.f32.mrb[0].mxu0 }
 0x231   : > { %v2117_v55 = vpop.f32.mrb[1].mxu0  ;;  %2176 = vmatpush3.msra.mxu0 %v356_v53  ;;  %2158 = vmatmul.mubr.msk.f32.gmra.mrb[4].mxu1 %vm435_vm5, %v2983_v9 }
 0x232   : > { %2178 = vmatmul.mubr.msk.f32.vlgmr.msra.gmra.mrb[16].mxu0 %vm435_vm5, %v2943_v1  ;;  %2352 = vmatprep.subr.bf16.mxu0 %v2702_v38 }
 0x233   : > { %2180 = vmatprep.mubr.msk.f32.mxu0 %vm2703_vm3, %v3550_v39  ;;  %2160 = vmatprep.mubr.msk.f32.mxu1 %vm2703_vm3, %v3550_v39 }
 0x234   : > { %v3182_v57 = vpop.f32.mrb[2].mxu0 }
 0x235   : > { %v557_v58 = vmul.f32 %v3182_v57, %v3182_v57  ;;  %v2133_v59 = vpop.f32.mrb[3].mxu0  ;;  %2161 = vmatmul.mubr.msk.f32.gmra.mrb[6].mxu1 %vm435_vm5, %v2988_v10 }
 0x236   : > { %2181 = vmatmul.mubr.msk.f32.gmra.mrb[18].mxu0 %vm435_vm5, %v2948_v2  ;;  %2163 = vmatprep.mubr.msk.f32.mxu1 %vm2703_vm3, %v3550_v39 }
 0x237   : > { %2183 = vmatprep.mubr.msk.f32.mxu0 %vm2703_vm3, %v3550_v39  ;;  %v564_v60 = vsel %vm435_vm5, %v557_v58, 0.0  ;;  %v972_v58 = vld [vmem:[%s970_s18 + $0x8] sm:$0xff] }
 0x238   : > { %565 = vadd.xlane.f32.xlu0 %v564_v60  ;;  %v3197_v61 = vpop.f32.mrb[4].mxu0  ;;  %v2347_v59 = vpack.c.bf16 %v972_v58, %v971_v56  ;;  %v973_v60 = vld [vmem:[%s970_s18 + $0x10] sm:$0xff] }
 0x239   : > { %v558_v62 = vmul.f32 %v3197_v61, %v3197_v61  ;;  %v2136_v63 = vpop.f32.mrb[5].mxu0  ;;  %2164 = vmatmul.mubr.msk.f32.gmra.mrb[8].mxu1 %vm435_vm5, %v2993_v11 }
 0x23a   : > { %2184 = vmatmul.mubr.msk.f32.gmra.mrb[20].mxu0 %vm435_vm5, %v2953_v3  ;;  %2166 = vmatprep.mubr.msk.f32.mxu1 %vm2703_vm3, %v3550_v39 }
 0x23b   : > { %2186 = vmatprep.mubr.msk.f32.mxu0 %vm2703_vm3, %v3550_v39  ;;  %v567_v32 = vsel %vm435_vm5, %v558_v62, 0.0  ;;  %2348 = vmatpush3.bf16.msra.mxu1 %v2347_v59  ;;  %v974_v62 = vld [vmem:[%s970_s18 + $0x18] sm:$0xff] }
 0x23c   : > { %v3210_v33 = vpop.f32.mrb[6].mxu0  ;;  %568 = vadd.xlane.f32.xlu0 %v567_v32  ;;  %2349 = vmatprep.subr.bf16.mxu1 %v2702_v38  ;;  %v2350_v63 = vpack.c.bf16 %v974_v62, %v973_v60  ;;  %v874_v32 = vpop.permute.xlu0 %873  ;;  %v3291_v60 = vld [vmem:[%s864_s16] ss:$0 sm:$0xff]  ;;  %s1778_s16 = scalar_lea.vmem %s3542_s25, %s2691_s21  ;;  %s277_s21 = sadd.s32 1, %s2691_s21  }
 0x23d   : > { %v559_v34 = vmul.f32 %v3210_v33, %v3210_v33  ;;  %v2139_v35 = vpop.f32.mrb[7].mxu0  ;;  %2167 = vmatmul.mubr.msk.f32.gmra.mrb[10].mxu1 %vm435_vm5, %v2998_v12  ;;  %v908_v19 = vmul.f32 %v3291_v60, %v874_v32  ;;  %p274_p12 = scmp.ge.s32.totalorder %s277_s21, 4  }
 0x23e   : > { %2187 = vmatmul.mubr.msk.f32.gmra.mrb[22].mxu0 %vm435_vm5, %v2958_v4  ;;  %2169 = vmatprep.mubr.msk.f32.mxu1 %vm2703_vm3, %v3550_v39  ;;  %s3587_s2 = sld [smem:[#allocation25_spill]] (%p274_p12)  ;;  %v2706_v1 = vmov (%p274_p12), 0.0|0.0   ;;  %s3589_s17 = sld [smem:[#allocation26_spill]] (%p274_p12)  ;;  %vm1872_vm7 = vcmask (%p274_p12), 48128  }
 0x23f   : > { %2189 = vmatprep.mubr.msk.f32.mxu0 %vm2703_vm3, %v3550_v39  ;;  %v570_v37 = vsel %vm435_vm5, %v559_v34, 0.0  ;;  %2351 = vmatpush3.bf16.msra.mxu1 %v2350_v63  ;;  %s2707_s19 = smov (%p274_p12), [#allocation11]  }
 0x240   : > { %v3223_v40 = vpop.f32.mrb[8].mxu0  ;;  %571 = vadd.xlane.f32.xlu1 %v570_v37  ;;  %2358 = vmatprep.subr.bf16.mxu1 %v2702_v38  ;;  %v879_v34 = vpop.permute.xlu0 %878  ;;  %s1882_s20 = sshll.u32 (%p274_p12), %s2707_s19, 4  ;;  %s1883_s20 = int_to_ptr.vmem [resolvable:$true] %s1882_s20 }
 0x241   : > { %v560_v41 = vmul.f32 %v3223_v40, %v3223_v40  ;;  %v2142_v42 = vpop.f32.mrb[9].mxu0  ;;  %2170 = vmatmul.mubr.msk.f32.gmra.mrb[12].mxu1 %vm435_vm5, %v3007_v15  ;;  %s2639_s23 = scalar_lea.vmem (%p274_p12), %s1883_s20, 128  ;;  %p2644_p0 = scmp.lt.s32.totalorder (%p274_p12), %s1883_s20, %s1883_s20 }
 0x242   : > { %2190 = vmatmul.mubr.msk.f32.gmra.mrb[24].mxu0 %vm435_vm5, %v2963_v5  ;;  %2172 = vmatprep.mubr.msk.f32.mxu1 %vm2703_vm3, %v3550_v39  ;;  %p2640_p13 = scmp.ne.s32.totalorder (%p274_p12), %s1883_s20, %s2639_s23  ;;  %p2645_p1 = scmp.lt.s32.totalorder (%p274_p12), %s2639_s23, %s2639_s23 }
 0x243   : > { %2192 = vmatprep.mubr.msk.f32.mxu0 %vm2703_vm3, %v3550_v39  ;;  %v573_v43 = vsel %vm435_vm5, %v560_v41, 0.0  ;;  %v869_v41 = vpop.permute.xlu1 %868 }
 0x244   : > { %574 = vadd.xlane.f32.xlu0 %v573_v43  ;;  %v3236_v44 = vpop.f32.mrb[10].mxu0  ;;  %v884_v35 = vpop.permute.xlu0 %883  ;;  %v907_v13 = vmul.f32 %v3291_v60, %v869_v41  ;;  %v1790_v3 = vld [vmem:[%s3587_s2 + $0x18] sm:$0xff] (%p274_p12)  ;;  %v2006_v5 = vld [vmem:[%s3589_s17] ss:$0 sm:$0xff] (%p274_p12)  ;;  %p2646_p2 = por (%p274_p12), %p2645_p1, %p2644_p0 }
 0x245   : > { %v561_v45 = vmul.f32 %v3236_v44, %v3236_v44  ;;  %v2145_v46 = vpop.f32.mrb[11].mxu0  ;;  %2173 = vmatmul.mubr.msk.f32.gmra.mrb[14].mxu1 %vm435_vm5, %v3012_v16 }
 0x246   : > { %2193 = vmatmul.mubr.msk.f32.gmra.mrb[26].mxu0 %vm435_vm5, %v2968_v6  ;;  %2206 = vmatprep.mubr.msk.f32.mxu1 %vm2703_vm3, %v3550_v39  ;;  %p2647_p3 = pnand (%p274_p12), %p2646_p2, %p2640_p13 }
 0x247   : > { %2195 = vmatprep.mubr.msk.f32.mxu0 %vm2703_vm3, %v3550_v39  ;;  %v576_v47 = vsel %vm435_vm5, %v561_v45, 0.0  ;;  %v3278_v45 = vld [vmem:[%s827_s7] ss:$0 sm:$0xff]  ;;  %s1530_s7 = scalar_lea.vmem [#allocation7], %s3099_s10 }
 0x248   : > { %577 = vadd.xlane.f32.xlu1 %v576_v47  ;;  %v3249_v48 = vpop.f32.mrb[12].mxu0  ;;  %v3272_v37 = vpop.permute.xlu0 %888 }
 0x249   : > { %v562_v49 = vmul.f32 %v3249_v48, %v3249_v48  ;;  %v2148_v50 = vpop.f32.mrb[13].mxu0 }
 0x24a   : > { %2196 = vmatmul.mubr.msk.f32.gmra.mrb[28].mxu0 %vm435_vm5, %v2973_v7 }
 0x24b   : > { %v579_v51 = vsel %vm435_vm5, %v562_v49, 0.0  ;;  %2235 = vmatprep.mubr.msk.f32.mxu0 %vm2703_vm3, %v3550_v39 }
 0x24c   : > { %580 = vadd.xlane.f32.xlu1 %v579_v51  ;;  %v3260_v52 = vpop.f32.mrb[14].mxu0 }
 0x24d   : > { %v563_v53 = vmul.f32 %v3260_v52, %v3260_v52  ;;  %v2151_v54 = vpop.f32.mrb[15].mxu0 }
 0x24f   : > { %v582_v55 = vsel %vm435_vm5, %v563_v53, 0.0 }
 0x250   : > { %583 = vadd.xlane.f32.xlu1 %v582_v55  ;;  %v3289_v55 = vld [vmem:[%s849_s8] ss:$0 sm:$0xff] }
 0x25a   : > { %898 = vperm.xlu0 %2440, %v3067_v30  }
 0x261   : > { %893 = vperm.xlu1 %2439, %v3062_v29  }
 0x2c5   : > { %v566_v42 = vpop.xlane.xlu0 %565 }
 0x2c6   : > { %v835_v50 = vmul.f32 %v3278_v45, %v566_v42 }
 0x2c9   : > { %v569_v54 = vpop.xlane.xlu0 %568 }
 0x2cd   : > { %v572_v43 = vpop.xlane.xlu1 %571 }
 0x2ce   : > { %v837_v20 = vmul.f32 %v3278_v45, %v572_v43 }
 0x2d5   : > { %v578_v56 = vpop.xlane.xlu1 %577 }
 0x2d9   : > { %v581_v21 = vpop.xlane.xlu1 %580 }
 0x300   : > { %v672_v47 = vpop.f32.mrb[2].mxu1 }
 0x301   : > { %v2156_v53 = vpop.f32.mrb[3].mxu1 }
 0x304   : > { %v677_v62 = vpop.f32.mrb[4].mxu1 }
 0x305   : > { %v793_v46 = vpop.f32.mrb[16].mxu0  ;;  %v2159_v42 = vpop.f32.mrb[5].mxu1 }
 0x306   : > { %v2179_v49 = vpop.f32.mrb[17].mxu0  ;;  %v794_v51 = vadd.f32 %v793_v46, %v672_v47 }
 0x307   : > { %v836_v49 = vmul.f32 %v3278_v45, %v569_v54 }
 0x308   : > { %v842_v58 = vadd.f32 %v835_v50, %v794_v51  ;;  %v682_v50 = vpop.f32.mrb[6].mxu1 }
 0x309   : > { %v798_v59 = vpop.f32.mrb[18].mxu0  ;;  %v2162_v22 = vpop.f32.mrb[7].mxu1 }
 0x30a   : > { %v2182_v63 = vpop.f32.mrb[19].mxu0  ;;  %v857_v14 = vadd.f32 %v3289_v55, %v842_v58  ;;  %v799_v18 = vadd.f32 %v798_v59, %v677_v62  ;;  %v575_v58 = vpop.xlane.xlu0 %574 }
 0x30c   : > { %v3296_v46 = vadd.f32 %v907_v13, %v857_v14  ;;  %v843_v47 = vadd.f32 %v836_v49, %v799_v18  ;;  %v909_v18 = vmul.f32 %v3291_v60, %v879_v34  ;;  %v687_v32 = vpop.f32.mrb[8].mxu1  ;;  %v838_v49 = vmul.f32 %v3278_v45, %v575_v58 }
 0x30d   : > { %v803_v53 = vpop.f32.mrb[20].mxu0 }
 0x30e   : > { %v2185_v51 = vpop.f32.mrb[21].mxu0  ;;  %v1960_v63 = vmul.f32 -1.442695, %v3296_v46  ;;  %v858_v54 = vadd.f32 %v3289_v55, %v843_v47  ;;  %v804_v41 = vadd.f32 %v803_v53, %v682_v50  ;;  %v2165_v47 = vpop.f32.mrb[9].mxu1 }
 0x30f   : > { %v584_v53 = vpop.xlane.xlu1 %583 }
 0x310   : > { %2441 = vpow2.f32 %v1960_v63  ;;  %v3302_v59 = vadd.f32 %v908_v19, %v858_v54  ;;  %v844_v13 = vadd.f32 %v837_v20, %v804_v41  ;;  %v910_v20 = vmul.f32 %v3291_v60, %v884_v35  ;;  %v692_v63 = vpop.f32.mrb[10].mxu1 }
 0x311   : > { %v808_v14 = vpop.f32.mrb[22].mxu0  ;;  %v839_v54 = vmul.f32 %v3278_v45, %v578_v56 }
 0x312   : > { %v2188_v62 = vpop.f32.mrb[23].mxu0  ;;  %v1961_v43 = vmul.f32 -1.442695, %v3302_v59  ;;  %v859_v42 = vadd.f32 %v3289_v55, %v844_v13  ;;  %v809_v51 = vadd.f32 %v808_v14, %v687_v32  ;;  %v2168_v13 = vpop.f32.mrb[11].mxu1 }
 0x314   : > { %2443 = vpow2.f32 %v1961_v43  ;;  %v3308_v22 = vadd.f32 %v909_v18, %v859_v42  ;;  %v845_v19 = vadd.f32 %v838_v49, %v809_v51  ;;  %v911_v49 = vmul.f32 %v3291_v60, %v3272_v37  ;;  %v697_v43 = vpop.f32.mrb[12].mxu1 }
 0x315   : > { %v813_v50 = vpop.f32.mrb[24].mxu0  ;;  %v840_v51 = vmul.f32 %v3278_v45, %v581_v21 }
 0x316   : > { %v2191_v34 = vpop.f32.mrb[25].mxu0  ;;  %v1962_v41 = vmul.f32 -1.442695, %v3308_v22  ;;  %v860_v58 = vadd.f32 %v3289_v55, %v845_v19  ;;  %v814_v62 = vadd.f32 %v813_v50, %v692_v63  ;;  %v2171_v50 = vpop.f32.mrb[13].mxu1 }
 0x317   : > { %v894_v63 = vpop.permute.xlu1 %893 }
 0x318   : > { %2445 = vpow2.f32 %v1962_v41  ;;  %v3314_v14 = vadd.f32 %v910_v20, %v860_v58  ;;  %v846_v32 = vadd.f32 %v839_v54, %v814_v62  ;;  %v841_v58 = vmul.f32 %v3278_v45, %v584_v53  ;;  %v702_v37 = vpop.f32.mrb[14].mxu1 }
 0x319   : > { %v818_v18 = vpop.f32.mrb[26].mxu0  ;;  %v912_v21 = vmul.f32 %v3291_v60, %v894_v63 }
 0x31a   : > { %v2194_v35 = vpop.f32.mrb[27].mxu0  ;;  %v2442_v42 = vpop.eup %2441  ;;  %v1963_v56 = vmul.f32 -1.442695, %v3314_v14  ;;  %v861_v47 = vadd.f32 %v3289_v55, %v846_v32  ;;  %v819_v19 = vadd.f32 %v818_v18, %v697_v43 }
 0x31b   : > { %v942_v34 = vadd.f32 1.0, %v2442_v42  ;;  %v2174_v18 = vpop.f32.mrb[15].mxu1  ;;  %v899_v43 = vpop.permute.xlu0 %898 }
 0x31c   : > { %2447 = vpow2.f32 %v1963_v56  ;;  %v918_v20 = vadd.f32 %v911_v49, %v861_v47  ;;  %v847_v54 = vadd.f32 %v840_v51, %v819_v19  ;;  %v913_v45 = vmul.f32 %v3291_v60, %v899_v43 }
 0x31d   : > { %v823_v41 = vpop.f32.mrb[28].mxu0  ;;  %2449 = vrcp.f32 %v942_v34 }
 0x31e   : > { %v2197_v62 = vpop.f32.mrb[29].mxu0  ;;  %v2444_v13 = vpop.eup %2443  ;;  %v1964_v35 = vmul.f32 -1.442695, %v918_v20  ;;  %v862_v0 = vadd.f32 %v3289_v55, %v847_v54  ;;  %v824_v32 = vadd.f32 %v823_v41, %v702_v37 }
 0x31f   : > { %v943_v50 = vadd.f32 1.0, %v2444_v13 }
 0x320   : > { %2451 = vpow2.f32 %v1964_v35  ;;  %v919_v42 = vadd.f32 %v912_v21, %v862_v0  ;;  %v848_v49 = vadd.f32 %v841_v58, %v824_v32 }
 0x321   : > { %2453 = vrcp.f32 %v943_v50 }
 0x322   : > { %v2446_v51 = vpop.eup %2445  ;;  %v1965_v53 = vmul.f32 -1.442695, %v919_v42  ;;  %v863_v56 = vadd.f32 %v3289_v55, %v848_v49 }
 0x323   : > { %v944_v47 = vadd.f32 1.0, %v2446_v51 }
 0x324   : > { %2455 = vpow2.f32 %v1965_v53  ;;  %v920_v19 = vadd.f32 %v913_v45, %v863_v56  ;;  %v1155_v45 = vld [vmem:[%s1153_s24 + $0x8] sm:$0xff]  ;;  %v1157_v56 = vld [vmem:[%s1153_s24 + $0x18] sm:$0xff] }
 0x325   : > { %2457 = vrcp.f32 %v944_v47 }
 0x326   : > { %v2448_v63 = vpop.eup %2447  ;;  %v1966_v34 = vmul.f32 -1.442695, %v920_v19 }
 0x327   : > { %v2450_v54 = vpop.eup %2449  ;;  %v945_v41 = vadd.f32 1.0, %v2448_v63 }
 0x328   : > { %v963_v37 = vmul.f32 %v2450_v54, %v3296_v46  ;;  %2459 = vpow2.f32 %v1966_v34 }
 0x329   : > { %2461 = vrcp.f32 %v945_v41 }
 0x32a   : > { %v2452_v0 = vpop.eup %2451  ;;  %2207 = vmatmul.mubr.msk.f32.vlgmr.msra.gmra.mrb[16].mxu1 %vm286_vm4, %v963_v37 }
 0x32b   : > { %v2454_v58 = vpop.eup %2453  ;;  %v946_v60 = vadd.f32 1.0, %v2452_v0  ;;  %2209 = vmatprep.mubr.msk.f32.mxu1 %vm2703_vm3, %v3550_v39 }
 0x32c   : > { %v964_v55 = vmul.f32 %v2454_v58, %v3302_v59 }
 0x32d   : > { %2463 = vrcp.f32 %v946_v60 }
 0x32e   : > { %v2456_v62 = vpop.eup %2455  ;;  %2210 = vmatmul.mubr.msk.f32.gmra.mrb[18].mxu1 %vm286_vm4, %v964_v55 }
 0x32f   : > { %v2458_v13 = vpop.eup %2457  ;;  %v947_v21 = vadd.f32 1.0, %v2456_v62  ;;  %2212 = vmatprep.mubr.msk.f32.mxu1 %vm2703_vm3, %v3550_v39 }
 0x330   : > { %v965_v46 = vmul.f32 %v2458_v13, %v3308_v22 }
 0x331   : > { %2465 = vrcp.f32 %v947_v21 }
 0x332   : > { %v2460_v35 = vpop.eup %2459  ;;  %2213 = vmatmul.mubr.msk.f32.gmra.mrb[20].mxu1 %vm286_vm4, %v965_v46 }
 0x333   : > { %v2462_v32 = vpop.eup %2461  ;;  %v948_v18 = vadd.f32 1.0, %v2460_v35  ;;  %2215 = vmatprep.mubr.msk.f32.mxu1 %vm2703_vm3, %v3550_v39 }
 0x334   : > { %v966_v59 = vmul.f32 %v2462_v32, %v3314_v14 }
 0x335   : > { %2467 = vrcp.f32 %v948_v18 }
 0x336   : > { %2216 = vmatmul.mubr.msk.f32.gmra.mrb[22].mxu1 %vm286_vm4, %v966_v59 }
 0x337   : > { %v2464_v43 = vpop.eup %2463  ;;  %2218 = vmatprep.mubr.msk.f32.mxu1 %vm2703_vm3, %v3550_v39 }
 0x338   : > { %v967_v22 = vmul.f32 %v2464_v43, %v918_v20  ;;  %v1154_v20 = vld [vmem:[%s1153_s24] sm:$0xff] }
 0x339   : > { %v2353_v53 = vpack.c.bf16 %v1155_v45, %v1154_v20 }
 0x33a   : > { %2219 = vmatmul.mubr.msk.f32.gmra.mrb[24].mxu1 %vm286_vm4, %v967_v22 }
 0x33b   : > { %v2466_v50 = vpop.eup %2465  ;;  %2221 = vmatprep.mubr.msk.f32.mxu1 %vm2703_vm3, %v3550_v39  ;;  %2354 = vmatpush3.bf16.msra.mxu0 %v2353_v53 }
 0x33c   : > { %v968_v49 = vmul.f32 %v2466_v50, %v919_v42  ;;  %2355 = vmatprep.subr.bf16.mxu0 %v2702_v38  ;;  %v1156_v42 = vld [vmem:[%s1153_s24 + $0x10] sm:$0xff] }
 0x33d   : > { %v2356_v47 = vpack.c.bf16 %v1157_v56, %v1156_v42 }
 0x33e   : > { %2222 = vmatmul.mubr.msk.f32.gmra.mrb[26].mxu1 %vm286_vm4, %v968_v49 }
 0x33f   : > { %v2468_v51 = vpop.eup %2467  ;;  %2224 = vmatprep.mubr.msk.f32.mxu1 %vm2703_vm3, %v3550_v39  ;;  %2357 = vmatpush3.bf16.msra.mxu0 %v2356_v47 }
 0x340   : > { %v969_v14 = vmul.f32 %v2468_v51, %v920_v19  ;;  %2382 = vmatprep.subr.bf16.mxu0 %v2702_v38  ;;  %v1967_v19 = vld [vmem:[%s975_s3] ss:$0 sm:$0xff] }
 0x342   : > { %2225 = vmatmul.mubr.msk.f32.gmra.mrb[28].mxu1 %vm286_vm4, %v969_v14 }
 0x343   : > { %2270 = vmatprep.mubr.msk.f32.mxu1 %vm2703_vm3, %v3550_v39 }
 0x3fd   : > { %v1070_v63 = vpop.f32.mrb[16].mxu1 }
 0x3fe   : > { %v1071_v34 = vadd.f32 %v1967_v19, %v1070_v63  ;;  %v2208_v54 = vpop.f32.mrb[17].mxu1 }
 0x400   : > { %v1975_v41 = vmul.f32 -1.442695, %v1071_v34 }
 0x401   : > { %v1075_v37 = vpop.f32.mrb[18].mxu1 }
 0x402   : > { %2469 = vpow2.f32 %v1975_v41  ;;  %v1076_v0 = vadd.f32 %v1967_v19, %v1075_v37  ;;  %v2211_v58 = vpop.f32.mrb[19].mxu1 }
 0x404   : > { %v1976_v60 = vmul.f32 -1.442695, %v1076_v0 }
 0x405   : > { %v1080_v55 = vpop.f32.mrb[20].mxu1 }
 0x406   : > { %2471 = vpow2.f32 %v1976_v60  ;;  %v1081_v62 = vadd.f32 %v1967_v19, %v1080_v55  ;;  %v2214_v13 = vpop.f32.mrb[21].mxu1 }
 0x408   : > { %v1977_v21 = vmul.f32 -1.442695, %v1081_v62 }
 0x409   : > { %v1085_v46 = vpop.f32.mrb[22].mxu1 }
 0x40a   : > { %2473 = vpow2.f32 %v1977_v21  ;;  %v1086_v35 = vadd.f32 %v1967_v19, %v1085_v46  ;;  %v2217_v32 = vpop.f32.mrb[23].mxu1 }
 0x40c   : > { %v2470_v18 = vpop.eup %2469  ;;  %v1978_v59 = vmul.f32 -1.442695, %v1086_v35 }
 0x40d   : > { %v1125_v43 = vadd.f32 1.0, %v2470_v18  ;;  %v1090_v22 = vpop.f32.mrb[24].mxu1 }
 0x40e   : > { %2475 = vpow2.f32 %v1978_v59  ;;  %v1091_v50 = vadd.f32 %v1967_v19, %v1090_v22  ;;  %v2220_v49 = vpop.f32.mrb[25].mxu1 }
 0x40f   : > { %2477 = vrcp.f32 %v1125_v43 }
 0x410   : > { %v2472_v51 = vpop.eup %2471  ;;  %v1979_v14 = vmul.f32 -1.442695, %v1091_v50 }
 0x411   : > { %v1126_v20 = vadd.f32 1.0, %v2472_v51  ;;  %v1095_v45 = vpop.f32.mrb[26].mxu1 }
 0x412   : > { %2479 = vpow2.f32 %v1979_v14  ;;  %v1096_v53 = vadd.f32 %v1967_v19, %v1095_v45  ;;  %v2223_v42 = vpop.f32.mrb[27].mxu1 }
 0x413   : > { %2481 = vrcp.f32 %v1126_v20 }
 0x414   : > { %v2474_v56 = vpop.eup %2473  ;;  %v1980_v47 = vmul.f32 -1.442695, %v1096_v53 }
 0x415   : > { %v1127_v63 = vadd.f32 1.0, %v2474_v56  ;;  %v1100_v54 = vpop.f32.mrb[28].mxu1 }
 0x416   : > { %2483 = vpow2.f32 %v1980_v47  ;;  %v1101_v41 = vadd.f32 %v1967_v19, %v1100_v54  ;;  %v2226_v37 = vpop.f32.mrb[29].mxu1 }
 0x417   : > { %2485 = vrcp.f32 %v1127_v63 }
 0x418   : > { %v2476_v58 = vpop.eup %2475  ;;  %v1981_v60 = vmul.f32 -1.442695, %v1101_v41 }
 0x419   : > { %v2478_v55 = vpop.eup %2477  ;;  %v1128_v13 = vadd.f32 1.0, %v2476_v58 }
 0x41a   : > { %v3358_v21 = vmul.f32 %v2478_v55, %v1071_v34  ;;  %2487 = vpow2.f32 %v1981_v60 }
 0x41b   : > { %2489 = vrcp.f32 %v1128_v13 }
 0x41c   : > { %v2480_v46 = vpop.eup %2479  ;;  %2236 = vmatmul.mubr.msk.f32.vlgmr.msra.gmra.mrb[30].mxu0 %vm286_vm4, %v3358_v21 }
 0x41d   : > { %v2482_v32 = vpop.eup %2481  ;;  %v1129_v18 = vadd.f32 1.0, %v2480_v46  ;;  %2238 = vmatprep.mubr.msk.f32.mxu0 %vm2703_vm3, %v3550_v39 }
 0x41e   : > { %v3364_v19 = vmul.f32 %v2482_v32, %v1076_v0 }
 0x41f   : > { %2491 = vrcp.f32 %v1129_v18 }
 0x420   : > { %v2484_v59 = vpop.eup %2483  ;;  %2239 = vmatmul.mubr.msk.f32.gmra.mrb[32].mxu0 %vm286_vm4, %v3364_v19 }
 0x421   : > { %v2486_v34 = vpop.eup %2485  ;;  %v1130_v22 = vadd.f32 1.0, %v2484_v59  ;;  %2241 = vmatprep.mubr.msk.f32.mxu0 %vm2703_vm3, %v3550_v39 }
 0x422   : > { %v3372_v49 = vmul.f32 %v2486_v34, %v1081_v62 }
 0x423   : > { %2493 = vrcp.f32 %v1130_v22 }
 0x424   : > { %v2488_v51 = vpop.eup %2487  ;;  %2242 = vmatmul.mubr.msk.f32.gmra.mrb[34].mxu0 %vm286_vm4, %v3372_v49 }
 0x425   : > { %v2490_v0 = vpop.eup %2489  ;;  %v1131_v14 = vadd.f32 1.0, %v2488_v51  ;;  %2244 = vmatprep.mubr.msk.f32.mxu0 %vm2703_vm3, %v3550_v39 }
 0x426   : > { %v3378_v20 = vmul.f32 %v2490_v0, %v1086_v35 }
 0x427   : > { %2495 = vrcp.f32 %v1131_v14 }
 0x428   : > { %2245 = vmatmul.mubr.msk.f32.gmra.mrb[36].mxu0 %vm286_vm4, %v3378_v20 }
 0x429   : > { %v2492_v62 = vpop.eup %2491  ;;  %2247 = vmatprep.mubr.msk.f32.mxu0 %vm2703_vm3, %v3550_v39 }
 0x42a   : > { %v3386_v42 = vmul.f32 %v2492_v62, %v1091_v50 }
 0x42c   : > { %2248 = vmatmul.mubr.msk.f32.gmra.mrb[38].mxu0 %vm286_vm4, %v3386_v42 }
 0x42d   : > { %v2494_v56 = vpop.eup %2493  ;;  %2250 = vmatprep.mubr.msk.f32.mxu0 %vm2703_vm3, %v3550_v39 }
 0x42e   : > { %v3392_v35 = vmul.f32 %v2494_v56, %v1096_v53  ;;  %v1982_v53 = vld [vmem:[%s1158_s22] ss:$0 sm:$0xff] }
 0x430   : > { %2251 = vmatmul.mubr.msk.f32.gmra.mrb[40].mxu0 %vm286_vm4, %v3392_v35 }
 0x431   : > { %v2496_v63 = vpop.eup %2495  ;;  %2253 = vmatprep.mubr.msk.f32.mxu0 %vm2703_vm3, %v3550_v39 }
 0x432   : > { %v3400_v50 = vmul.f32 %v2496_v63, %v1101_v41 }
 0x434   : > { %2254 = vmatmul.mubr.msk.f32.gmra.mrb[42].mxu0 %vm286_vm4, %v3400_v50 }
 0x435   : > { %2309 = vmatprep.mubr.msk.f32.mxu0 %vm2703_vm3, %v3550_v39 }
 0x4ef   : > { %v1253_v54 = vpop.f32.mrb[30].mxu0 }
 0x4f0   : > { %v1254_v37 = vadd.f32 %v1982_v53, %v1253_v54  ;;  %v2237_v58 = vpop.f32.mrb[31].mxu0 }
 0x4f2   : > { %v1990_v60 = vmul.f32 -1.442695, %v1254_v37 }
 0x4f3   : > { %v1258_v55 = vpop.f32.mrb[32].mxu0 }
 0x4f4   : > { %2497 = vpow2.f32 %v1990_v60  ;;  %v1259_v13 = vadd.f32 %v1982_v53, %v1258_v55  ;;  %v2240_v41 = vpop.f32.mrb[33].mxu0 }
 0x4f6   : > { %v1991_v46 = vmul.f32 -1.442695, %v1259_v13 }
 0x4f7   : > { %v1263_v32 = vpop.f32.mrb[34].mxu0 }
 0x4f8   : > { %2499 = vpow2.f32 %v1991_v46  ;;  %v1264_v18 = vadd.f32 %v1982_v53, %v1263_v32  ;;  %v2243_v59 = vpop.f32.mrb[35].mxu0 }
 0x4fa   : > { %v1992_v34 = vmul.f32 -1.442695, %v1264_v18 }
 0x4fb   : > { %v1268_v22 = vpop.f32.mrb[36].mxu0 }
 0x4fc   : > { %2501 = vpow2.f32 %v1992_v34  ;;  %v1269_v51 = vadd.f32 %v1982_v53, %v1268_v22  ;;  %v2246_v0 = vpop.f32.mrb[37].mxu0 }
 0x4fe   : > { %v2498_v14 = vpop.eup %2497  ;;  %v1993_v62 = vmul.f32 -1.442695, %v1269_v51 }
 0x4ff   : > { %v1308_v56 = vadd.f32 1.0, %v2498_v14  ;;  %v1273_v63 = vpop.f32.mrb[38].mxu0 }
 0x500   : > { %2503 = vpow2.f32 %v1993_v62  ;;  %v1274_v54 = vadd.f32 %v1982_v53, %v1273_v63  ;;  %v2249_v58 = vpop.f32.mrb[39].mxu0 }
 0x501   : > { %2505 = vrcp.f32 %v1308_v56 }
 0x502   : > { %v2500_v60 = vpop.eup %2499  ;;  %v1994_v55 = vmul.f32 -1.442695, %v1274_v54 }
 0x503   : > { %v1309_v41 = vadd.f32 1.0, %v2500_v60  ;;  %v1278_v46 = vpop.f32.mrb[40].mxu0  ;;  %v1997_v60 = vld [vmem:[%s1336_s4] ss:$0 sm:$0xff] }
 0x504   : > { %2507 = vpow2.f32 %v1994_v55  ;;  %v1279_v32 = vadd.f32 %v1982_v53, %v1278_v46  ;;  %v2252_v59 = vpop.f32.mrb[41].mxu0 }
 0x505   : > { %2509 = vrcp.f32 %v1309_v41 }
 0x506   : > { %v2502_v34 = vpop.eup %2501  ;;  %v1995_v22 = vmul.f32 -1.442695, %v1279_v32 }
 0x507   : > { %v1310_v0 = vadd.f32 1.0, %v2502_v34  ;;  %v1283_v47 = vpop.f32.mrb[42].mxu0 }
 0x508   : > { %2511 = vpow2.f32 %v1995_v22  ;;  %v1284_v14 = vadd.f32 %v1982_v53, %v1283_v47  ;;  %v2255_v45 = vpop.f32.mrb[43].mxu0 }
 0x509   : > { %2513 = vrcp.f32 %v1310_v0 }
 0x50a   : > { %v2504_v62 = vpop.eup %2503  ;;  %v1996_v56 = vmul.f32 -1.442695, %v1284_v14 }
 0x50b   : > { %v2506_v63 = vpop.eup %2505  ;;  %v1311_v58 = vadd.f32 1.0, %v2504_v62 }
 0x50c   : > { %v1329_v55 = vmul.f32 %v2506_v63, %v1254_v37  ;;  %2515 = vpow2.f32 %v1996_v56 }
 0x50d   : > { %2517 = vrcp.f32 %v1311_v58 }
 0x50e   : > { %v2508_v41 = vpop.eup %2507  ;;  %v1344_v46 = vmul.f32 %v1997_v60, %v1329_v55 }
 0x50f   : > { %v2510_v59 = vpop.eup %2509  ;;  %v1312_v34 = vadd.f32 1.0, %v2508_v41 }
 0x510   : > { %v1330_v22 = vmul.f32 %v2510_v59, %v1259_v13  ;;  %v1351_v45 = vsel %vm286_vm4, %v1344_v46, 0.0 }
 0x511   : > { %2519 = vrcp.f32 %v1312_v34  ;;  %1352 = vadd.xlane.f32.xlu0 %v1351_v45 }
 0x512   : > { %v2512_v47 = vpop.eup %2511  ;;  %v1345_v53 = vmul.f32 %v1997_v60, %v1330_v22 }
 0x513   : > { %v2514_v0 = vpop.eup %2513  ;;  %v1313_v43 = vadd.f32 1.0, %v2512_v47 }
 0x514   : > { %v1331_v39 = vmul.f32 %v2514_v0, %v1264_v18  ;;  %v1354_v62 = vsel %vm286_vm4, %v1345_v53, 0.0 }
 0x515   : > { %2521 = vrcp.f32 %v1313_v43  ;;  %1355 = vadd.xlane.f32.xlu1 %v1354_v62 }
 0x516   : > { %v2516_v37 = vpop.eup %2515  ;;  %v1346_v56 = vmul.f32 %v1997_v60, %v1331_v39 }
 0x517   : > { %v2518_v63 = vpop.eup %2517  ;;  %v1314_v58 = vadd.f32 1.0, %v2516_v37 }
 0x518   : > { %v1332_v55 = vmul.f32 %v2518_v63, %v1269_v51  ;;  %v1357_v13 = vsel %vm286_vm4, %v1346_v56, 0.0 }
 0x519   : > { %2523 = vrcp.f32 %v1314_v58  ;;  %1358 = vadd.xlane.f32.xlu0 %v1357_v13 }
 0x51a   : > { %v1347_v41 = vmul.f32 %v1997_v60, %v1332_v55 }
 0x51b   : > { %v2520_v46 = vpop.eup %2519 }
 0x51c   : > { %v1333_v59 = vmul.f32 %v2520_v46, %v1274_v54  ;;  %v1360_v34 = vsel %vm286_vm4, %v1347_v41, 0.0 }
 0x51d   : > { %1361 = vadd.xlane.f32.xlu0 %v1360_v34 }
 0x51e   : > { %v1348_v18 = vmul.f32 %v1997_v60, %v1333_v59 }
 0x51f   : > { %v2522_v22 = vpop.eup %2521 }
 0x520   : > { %v1334_v45 = vmul.f32 %v2522_v22, %v1279_v32  ;;  %v1363_v43 = vsel %vm286_vm4, %v1348_v18, 0.0  ;;  %v3581_v18 = vmov 0.0  }
 0x521   : > { %1364 = vadd.xlane.f32.xlu0 %v1363_v43  ;;  %v1534_v43 = vld [vmem:[%s1530_s7 + $0x18] sm:$0xff] }
 0x522   : > { %v1349_v39 = vmul.f32 %v1997_v60, %v1334_v45  ;;  %v1533_v45 = vld [vmem:[%s1530_s7 + $0x10] sm:$0xff] }
 0x523   : > { %v2524_v47 = vpop.eup %2523 }
 0x524   : > { %v1335_v53 = vmul.f32 %v2524_v47, %v1284_v14  ;;  %v1366_v51 = vsel %vm286_vm4, %v1349_v39, 0.0  ;;  %v2386_v39 = vpack.c.bf16 %v1534_v43, %v1533_v45 }
 0x525   : > { %1367 = vadd.xlane.f32.xlu0 %v1366_v51 }
 0x526   : > { %v1350_v0 = vmul.f32 %v1997_v60, %v1335_v53 }
 0x528   : > { %v1369_v62 = vsel %vm286_vm4, %v1350_v0, 0.0 }
 0x529   : > { %1370 = vadd.xlane.f32.xlu1 %v1369_v62 }
 0x53b   : > { %1455 = vperm.xlu0 %2440, %v3032_v23  }
 0x59e   : > { %v1353_v54 = vpop.xlane.xlu0 %1352 }
 0x59f   : > { %v1372_v56 = vmul.f32 %v1353_v54, %v3182_v57 }
 0x5a2   : > { %v1356_v37 = vpop.xlane.xlu1 %1355 }
 0x5a3   : > { %v1373_v32 = vmul.f32 %v1356_v37, %v3197_v61 }
 0x5a5   : > { %v2359_v63 = vpack.c.bf16 %v1373_v32, %v1372_v56 }
 0x5a6   : > { %v1359_v58 = vpop.xlane.xlu0 %1358 }
 0x5a7   : > { %2360 = vmatpush3.bf16.msra.mxu1 %v2359_v63  ;;  %v1374_v55 = vmul.f32 %v1359_v58, %v3210_v33  ;;  %v3582_v33 = vpack.c.bf16 %v3364_v19, %v3358_v21  ;;  %v1531_v21 = vld [vmem:[%s1530_s7] sm:$0xff]  ;;  %v1701_v58 = vld [vmem:[%s1699_s9 + $0x8] sm:$0xff] }
 0x5a8   : > { %2361 = vmatprep.subr.bf16.mxu1 %v2702_v38  ;;  %v1700_v63 = vld [vmem:[%s1699_s9] sm:$0xff] }
 0x5aa   : > { %v1362_v14 = vpop.xlane.xlu0 %1361 }
 0x5ab   : > { %v1375_v60 = vmul.f32 %v1362_v14, %v3223_v40  ;;  %v3583_v40 = vpack.c.bf16 %v3378_v20, %v3372_v49  ;;  %v1532_v49 = vld [vmem:[%s1530_s7 + $0x8] sm:$0xff]  ;;  %v1538_v20 = vld [vmem:[%s1535_s6 + $0x10] sm:$0xff]  ;;  %v2389_v14 = vpack.c.bf16 %v1701_v58, %v1700_v63 }
 0x5ad   : > { %v2362_v13 = vpack.c.bf16 %v1375_v60, %v1374_v55  ;;  %v1702_v55 = vld [vmem:[%s1699_s9 + $0x10] sm:$0xff]  ;;  %v1703_v60 = vld [vmem:[%s1699_s9 + $0x18] sm:$0xff] }
 0x5ae   : > { %v1365_v41 = vpop.xlane.xlu0 %1364 }
 0x5af   : > { %2363 = vmatpush3.bf16.msra.mxu1 %v2362_v13  ;;  %v1376_v57 = vmul.f32 %v1365_v41, %v3236_v44  ;;  %v3584_v44 = vpack.c.bf16 %v3392_v35, %v3386_v42  ;;  %v1539_v42 = vld [vmem:[%s1535_s6 + $0x18] sm:$0xff]  ;;  %v2383_v35 = vpack.c.bf16 %v1532_v49, %v1531_v21  ;;  %v2002_v41 = vld [vmem:[%s1683_s28] ss:$0 sm:$0xff]  ;;  %v3588_v49 = vmov (%p274_p12), 0.0  }
 0x5b0   : > { %2364 = vmatprep.subr.bf16.mxu1 %v2702_v38  ;;  %v1787_v21 = vld [vmem:[%s3587_s2] sm:$0xff] (%p274_p12) }
 0x5b1   : > { %2384 = vmatpush3.bf16.msra.mxu0 %v2383_v35 }
 0x5b2   : > { %v1368_v46 = vpop.xlane.xlu0 %1367  ;;  %2385 = vmatprep.subr.bf16.mxu0 %v2702_v38 }
 0x5b3   : > { %v1377_v61 = vmul.f32 %v1368_v46, %v3249_v48  ;;  %v1536_v48 = vld [vmem:[%s1535_s6] sm:$0xff] }
 0x5b5   : > { %v2365_v59 = vpack.c.bf16 %v1377_v61, %v1376_v57  ;;  %2387 = vmatpush3.bf16.msra.mxu0 %v2386_v39 }
 0x5b6   : > { %v1371_v34 = vpop.xlane.xlu1 %1370  ;;  %2394 = vmatprep.subr.bf16.mxu0 (%p274_p12), %v2706_v1 }
 0x5b7   : > { %2366 = vmatpush3.bf16.msra.mxu1 %v2365_v59  ;;  %v1378_v22 = vmul.f32 %v1371_v34, %v3260_v52  ;;  %v1537_v52 = vld [vmem:[%s1535_s6 + $0x8] sm:$0xff] }
 0x5b8   : > { %2268 = vmatprep.subr.mxu1 %v3581_v18  ;;  %v2377_v19 = vpack.c.bf16 %v1537_v52, %v1536_v48  ;;  %2310 = vmatmul.mubr.msk.f32.vlgmr.msra.gmra.mrb[44].mxu0 %vm286_vm4, %v2687_v36 }
 0x5b9   :  { %2331 = vmatprep.mubr.msk.f32.mxu0 (%p274_p12), %vm2701_vm0, %v3588_v49 }
 0x5ba   : > { %v1456_v47 = vpop.permute.xlu0 %1455 }
 0x5bb   : > { %2269 = vmatpush3.msra.mxu1 %v1378_v22 }
 0x5bc   : > { %2271 = vmatmul.mubr.msk.f32.vlgmr.msra.gmra.mrb[30].mxu1 %vm1379_vm6, %v3017_v17  ;;  %2367 = vmatprep.subr.bf16.mxu1 %v2702_v38 }
 0x5bd   : > { %2369 = vmatpush3.bf16.msra.mxu1 %v3582_v33  ;;  %2287 = vmatprep.mubr.msk.f32.mxu1 %vm2703_vm3, %v3581_v18 }
 0x5be   : > { %2370 = vmatprep.subr.bf16.mxu1 %v2702_v38 }
 0x5c1   : > { %2372 = vmatpush3.bf16.msra.mxu1 %v3583_v40  ;;  %v2005_v40 = vld [vmem:[%s1778_s16] ss:$0 sm:$0xff] }
 0x5c2   : > { %2373 = vmatprep.subr.bf16.mxu1 %v2702_v38 }
 0x5c5   : > { %2375 = vmatpush3.bf16.msra.mxu1 %v3584_v44 }
 0x5c6   : > { %2285 = vmatprep.subr.mxu1 %v3581_v18 }
 0x5c9   : > { %2286 = vmatpush3.msra.mxu1 %v3400_v50  ;;  %v2380_v50 = vpack.c.bf16 %v1539_v42, %v1538_v20 }
 0x5ca   : > { %2288 = vmatmul.mubr.msk.f32.vlgmr.msra.gmra.mrb[32].mxu1 %vm1379_vm6, %v3017_v17  ;;  %2376 = vmatprep.subr.bf16.mxu1 %v2702_v38 }
 0x5cb   : > { %2298 = vmatprep.mubr.msk.f32.mxu1 %vm2703_vm3, %v3581_v18  ;;  %2378 = vmatpush3.bf16.msra.mxu1 %v2377_v19  ;;  %v1789_v19 = vld [vmem:[%s3587_s2 + $0x10] sm:$0xff] (%p274_p12) }
 0x5cc   : > { %2379 = vmatprep.subr.bf16.mxu1 %v2702_v38  ;;  %v2398_v4 = vpack.c.bf16 (%p274_p12), %v1790_v3, %v1789_v19 }
 0x5cf   : > { %2381 = vmatpush3.bf16.msra.mxu1 %v2380_v50 }
 0x5d0   : > { %2388 = vmatprep.subr.bf16.mxu1 %v2702_v38 }
 0x68b   : > { %v1679_v56 = vpop.f32.mrb[44].mxu0 }
 0x68c   : > { %v2311_v32 = vpop.f32.mrb[45].mxu0 }
 0x68f   : > { %v1449_v53 = vpop.f32.mrb[30].mxu1 }
 0x690   : > { %v1458_v51 = vmul.f32 %v1456_v47, %v1449_v53  ;;  %v2272_v0 = vpop.f32.mrb[31].mxu1 }
 0x692   : > { %v1459_v62 = vadd.f32 %v2683_v31, %v1458_v51   ;;  %v2392_v31 = vpack.c.bf16 %v1703_v60, %v1702_v55 }
 0x694   :  { %1875 = vst.msk [vmem:[%s3544_s27] sm:$0xff] (%p274_p12), %vm435_vm5, %v1459_v62 }
 0x69d   : > { %v1526_v54 = vpop.f32.mrb[32].mxu1 }
 0x69e   : > { %2299 = vmatmul.mubr.msk.f32.vlgmr.msra.gmra.mrb[34].mxu1 %vm286_vm4, %v1526_v54  ;;  %v2289_v37 = vpop.f32.mrb[33].mxu1 }
 0x69f   : > { %2320 = vmatprep.mubr.msk.f32.mxu1 %vm2703_vm3, %v3581_v18  ;;  %2390 = vmatpush3.bf16.msra.mxu1 %v2389_v14 }
 0x6a0   : > { %2391 = vmatprep.subr.bf16.mxu1 %v2702_v38 }
 0x6a3   : > { %2393 = vmatpush3.bf16.msra.mxu1 %v2392_v31  ;;  %v3585_v31 = vmov %v1459_v62 }
 0x771   : > { %v1609_v13 = vpop.f32.mrb[34].mxu1 }
 0x772   : > { %v1680_v46 = vadd.f32 %v1679_v56, %v1609_v13  ;;  %v2300_v57 = vpop.f32.mrb[35].mxu1 }
 0x774   : > { %v1691_v61 = vadd.f32 %v2002_v41, %v1680_v46 }
 0x776   : > { %v2003_v59 = vmul.f32 -1.442695, %v1691_v61 }
 0x778   : > { %2525 = vpow2.f32 %v2003_v59 }
 0x782   : > { %v2526_v34 = vpop.eup %2525 }
 0x783   : > { %v1695_v18 = vadd.f32 1.0, %v2526_v34 }
 0x785   : > { %2527 = vrcp.f32 %v1695_v18 }
 0x78f   : > { %v2528_v38 = vpop.eup %2527 }
 0x790   : > { %v1698_v22 = vmul.f32 %v2528_v38, %v1691_v61 }
 0x792   : > { %2321 = vmatmul.mubr.msk.f32.vlgmr.msra.gmra.mrb[36].mxu1 %vm286_vm4, %v1698_v22 }
 0x864   :  { %276 = sbr.rel (!%p274_p12) target bundleno = 332 (0x14c), region = 174 }
 0x865   : > { %v1773_v33 = vpop.f32.mrb[36].mxu1 }
 0x866   : > { %v1777_v44 = vadd.f32 %v2687_v36, %v1773_v33  ;;  %v2322_v48 = vpop.f32.mrb[37].mxu1 }
 0x868   : > { %v1786_v52 = vadd.f32 %v2005_v40, %v1777_v44  }
 0x86a   : > { %v3586_v36 = vmov %v1786_v52 }
 0x86b   :  { %v1788_v36 = vld [vmem:[%s3587_s2 + $0x8] sm:$0xff] }
 0x86c   :  { %v2395_v2 = vpack.c.bf16 %v1788_v36, %v1787_v21 }
 0x86e   :  { %2396 = vmatpush3.bf16.msra.mxu0 %v2395_v2 }
 0x86f   :  { %2397 = vmatprep.subr.bf16.mxu0 %v2706_v1 }
 0x872   :  { %2399 = vmatpush3.bf16.msra.mxu0 %v2398_v4 }
 0x875   :  { %2332 = vmatmul.mubr.msk.f32.vlgmr.msra.gmra.mrb[0].mxu0 %vm286_vm4, %v1786_v52 }
 0x948   :  { %v1868_v6 = vpop.f32.mrb[0].mxu0 }
 0x949   :  { %v1869_v7 = vadd.f32 %v2006_v5, %v1868_v6  ;;  %v2333_v8 = vpop.f32.mrb[1].mxu0 }
 0x94b   :  { %1873 = vst.msk [vmem:[#allocation11] sm:$0xff] %vm1872_vm7, %v1869_v7 }
 0x94c   :  { %2650 = shalt.err (!%p2647_p3)
}
 0x94d   :  { %s2651_s21 = scalar_lea.hbm %s3543_s26, 128 }
 0x94e   :  { %p2652_p4 = scmp.ne.s32.totalorder %s3543_s26, %s2651_s21  ;;  %p2655_p5 = scmp.lt.u32.totalorder %s2651_s21, %s3543_s26 }
 0x950   :  { %p2657_p6 = pnand %p2655_p5, %p2652_p4 }
 0x952   :  { %2660 = shalt.err (!%p2657_p6)
}
 0x953   :  { %1885 = dma.vmem_to_hbm [thread:$0]  %s1883_s20, 128, %s3543_s26, [#allocation4]  }
 0x954   :  { %2679 = dma.done.wait [#allocation4], 128  }
 0x955   :  { %2680 = vsyncadd [#allocation4], 4294967168 }
 0x956   :  { %1893 = vsyncpa [#allocation3], 1 }
 0x957   :  { %1894 = vsyncpa [#allocation6], 1 }
 0x958   :  { %1895 = vsyncpa [#allocation9], 1 }
 0x959   :  { %1896 = vsyncpa [#allocation4], 1 }

</bundles_post_ra>
